<compile_context>
chip_gen: v6e
topology: v6e:2x2x1
jax: 0.10.0
libtpu: 0.0.40
codegen_flags: <defaults>
</compile_context>

<pallas_src>
import functools

import jax
import jax.numpy as jnp
from jax.experimental import pallas as pl
from jax.experimental.pallas import tpu as pltpu

LANE = 128


def _vmem_budget_bytes():
    """Per-generation scoped-VMEM budget: ~3/4 of physical VMEM, capped at 96 MiB.

    v5e/v6e (128 MiB physical) -> 96 MiB; v7x (64 MiB physical) -> 48 MiB.
    """
    try:
        cap = pltpu.get_tpu_info().vmem_capacity_bytes
    except Exception:
        cap = 64 * 1024 * 1024  # be conservative (v7x-sized) if the query fails
    return int(min(96 * 1024 * 1024, (cap * 3) // 4))


def conv_bn_silu_kernel(x_ref, w_ref, b_ref, o_ref, *, k):
    # x_ref: (Hp, Wp, C1)    bf16 zero-padded image of one batch element
    # w_ref: (k, k*C1, TC2)  bf16 BN-scale-folded weight; rows of each kh slab ordered (kw, c1)
    # b_ref: (1, TC2)        f32 folded BN bias
    # o_ref: (H*W, TC2)      bf16 output (one batch element, one C2 tile)
    Hp, Wp, C1 = x_ref.shape
    M, TC2 = o_ref.shape
    H = Hp - (k - 1)
    W = Wp - (k - 1)

    x = x_ref[...]                       # load the padded image once

    acc = None
    for kh in range(k):
        rows = x[kh:kh + H]              # (H, Wp, C1): leading-axis slice, cheap
        if C1 >= LANE:
            # Contraction depth C1 already fills the MXU: per-tap matmuls with f32
            # accumulation -- no lane-axis concat / patch copy at all (and on v7x the
            # partial sums accumulate through the MRB nearly for free).
            w_kh = w_ref[kh]             # (k*C1, TC2)
            for kw in range(k):
                lhs = rows[:, kw:kw + W, :].reshape(M, C1)
                part = jnp.dot(lhs, w_kh[kw * C1:(kw + 1) * C1],
                               preferred_element_type=jnp.float32)
                acc = part if acc is None else acc + part
        else:
            # Small C1: merge only the kw taps -> contraction depth k*C1 and a k-fold
            # (not k**2-fold) patch copy.  The (H, W, C1)->(H*W, C1) reshape is free when
            # W is a multiple of the bf16 sublane pack (16); W=16 here qualifies.
            # TODO(synk): for awkward W, pad W in the wrapper to keep this reshape free.
            taps = [rows[:, kw:kw + W, :].reshape(M, C1) for kw in range(k)]
            lhs = taps[0] if k == 1 else jnp.concatenate(taps, axis=-1)
            part = jnp.dot(lhs, w_ref[kh], preferred_element_type=jnp.float32)
            acc = part if acc is None else acc + part
    # NOTE: with C1=4, k=3 the contraction depth is only 12 -- such tiny-stem layers are
    # MXU-starved by construction (VPU/XLU-bound), which is why the epilogue below keeps
    # its transcendental work on the EUP slot.

    y = acc + b_ref[0]                                   # fused BN bias (f32)
    # SiLU: sigmoid via exp + approx reciprocal, both on the EUP slot (no VALU divide).
    y = y * pl.reciprocal(1.0 + jnp.exp(-y), approx=True)
    o_ref[...] = y.astype(o_ref.dtype)


@functools.partial(jax.jit, static_argnames=("k", "out_dtype"))
def conv_bn_silu(x_nhwc, w_hwio, bn_scale, bn_bias, *, k, out_dtype=jnp.bfloat16):
    """y = SiLU(BN(conv2d(x))) with stride=1, pad=k//2 (odd k), groups=1, dilation=1.

    x_nhwc: (N, H, W, C1); w_hwio: (k, k, C1, C2); bn_scale/bn_bias: (C2,) folded
    eval-mode BN affine.  Returns (N, H, W, C2) in `out_dtype` (bf16 default -- SiLU is
    still computed in f32 before the cast; downstream BiFPN convs consume bf16).
    """
    N, H, W, C1 = x_nhwc.shape
    kk, kk2, wc1, C2 = w_hwio.shape
    if kk != k or kk2 != k or wc1 != C1:
        raise ValueError("weight shape does not match (k, k, C1, C2)")
    if k % 2 != 1:
        raise NotImplementedError("only odd k (autopad p = k // 2) is implemented")
    p = k // 2
    Hp, Wp = H + 2 * p, W + 2 * p

    # Output-channel tiling: 256-wide tiles when C2 divides evenly (feeds the 256x256 MXU
    # on v6e/v7x), otherwise one tile of exactly C2.  C2 is NOT padded to a lane multiple:
    # padding 8 -> 128 would write 16x the needed output bytes and force a wrapper slice;
    # Mosaic masks the sub-128 store instead.
    TC2 = 256 if (C2 % 256 == 0) else C2
    nC = C2 // TC2

    # Fold the BN scale into the conv weight; lay it out as (k, k*C1, C2) so the rows of
    # each kh slab are ordered (kw, c1) -- matching the kernel's kw-merge/per-tap order.
    w_mat = (w_hwio * bn_scale.reshape(1, 1, 1, C2)).reshape(k, k * C1, C2)
    w_mat = w_mat.astype(jnp.bfloat16)
    bias = bn_bias.astype(jnp.float32).reshape(1, C2)

    # Zero-pad once; cast to bf16 BEFORE padding so the materialized padded copy is
    # 2 B/elem.  No halo tiling / stacking: each grid step consumes the whole padded
    # image of one batch element, so input HBM traffic stays ~1x.
    xp = jnp.pad(x_nhwc.astype(jnp.bfloat16), ((0, 0), (p, p), (p, p), (0, 0)))

    # VMEM accounting: double-buffered pipeline blocks + in-kernel patch/acc scratch.
    in_block = Hp * Wp * C1 * 2
    out_block = H * W * TC2 * 2
    w_block = k * (k * C1) * TC2 * 2
    scratch = in_block + k * H * W * C1 * 2 + H * W * TC2 * 4
    est = 2 * (in_block + out_block + w_block + 4 * TC2) + scratch
    budget = _vmem_budget_bytes()
    if est > budget:
        # TODO(synk): H-tiled variant with a manual halo DMA (memory_space=pl.ANY +
        # make_async_copy, double-buffered) for feature maps too large for this path.
        raise NotImplementedError(
            f"feature map needs ~{est} VMEM bytes, budget is {budget}")
    vmem_limit = int(min(budget, max(32 * 1024 * 1024, 2 * est)))

    out = pl.pallas_call(
        functools.partial(conv_bn_silu_kernel, k=k),
        # (N, H*W, C2): the kernel stores the matmul result directly (no in-kernel
        # reshape); the reshape below to NHWC is a free metadata op.
        out_shape=jax.ShapeDtypeStruct((N, H * W, C2), out_dtype),
        grid_spec=pltpu.PrefetchScalarGridSpec(
            num_scalar_prefetch=0,
            grid=(N, nC),
            in_specs=[
                pl.BlockSpec((None, Hp, Wp, C1), lambda n, c: (n, 0, 0, 0)),
                pl.BlockSpec((k, k * C1, TC2), lambda n, c: (0, 0, c)),
                pl.BlockSpec((1, TC2), lambda n, c: (0, c)),
            ],
            out_specs=pl.BlockSpec((None, H * W, TC2), lambda n, c: (n, 0, c)),
        ),
        compiler_params=pltpu.CompilerParams(
            # Both axes are independent -> v7x's two TensorCores split the work even
            # for small N.
            dimension_semantics=("parallel", "parallel"),
            vmem_limit_bytes=vmem_limit,
        ),
    )(xp, w_mat, bias)

    return out.reshape(N, H, W, C2)


def reference(x_nhwc, w_hwio, bn_scale, bn_bias, *, k):
    # Mirrors the kernel numerics: bf16 operands (MXU-native), f32 accumulation, BN scale
    # folded into the weight, bias + SiLU epilogue in f32.
    p = k // 2
    xb = x_nhwc.astype(jnp.bfloat16).astype(jnp.float32)
    wb = (w_hwio * bn_scale.reshape(1, 1, 1, -1)).astype(jnp.bfloat16).astype(jnp.float32)
    y = jax.lax.conv_general_dilated(
        xb, wb, window_strides=(1, 1), padding=[(p, p), (p, p)],
        dimension_numbers=("NHWC", "HWIO", "NHWC"),
        precision=jax.lax.Precision.HIGHEST)
    y = y + bn_bias.reshape(1, 1, 1, -1)
    return y * jax.nn.sigmoid(y)


if __name__ == "__main__":
    # Small shapes consistent with Conv(c1=4, c2=8, k=3): x is NCHW (2, 4, 16, 16).
    N, C1, H, W = 2, 4, 16, 16
    C2, K = 8, 3
    eps = 1e-5

    key = jax.random.PRNGKey(0)
    kx, kw3, kw1, kg, kb, km, kv = jax.random.split(key, 7)

    x_nchw = jax.random.normal(kx, (N, C1, H, W), jnp.float32)
    # Deterministic synthetic parameters (not a checkpoint load).
    w_oihw = 0.1 * jax.random.normal(kw3, (C2, C1, K, K), jnp.float32)   # Conv2d weight
    gamma = 1.0 + 0.1 * jax.random.normal(kg, (C2,), jnp.float32)        # BN weight
    beta = 0.1 * jax.random.normal(kb, (C2,), jnp.float32)               # BN bias
    running_mean = 0.1 * jax.random.normal(km, (C2,), jnp.float32)
    running_var = 1.0 + 0.1 * jax.random.uniform(kv, (C2,), jnp.float32)

    # Fold eval-mode BN into scale/bias.
    bn_scale = gamma / jnp.sqrt(running_var + eps)
    bn_bias = beta - running_mean * bn_scale

    # NCHW -> NHWC, OIHW -> HWIO for the TPU-friendly layout.
    x_nhwc = jnp.transpose(x_nchw, (0, 2, 3, 1))
    w_hwio = jnp.transpose(w_oihw, (2, 3, 1, 0))

    # k=3 (BiFPN's Conv blocks).
    out = jax.block_until_ready(conv_bn_silu(x_nhwc, w_hwio, bn_scale, bn_bias, k=K))
    ref = reference(x_nhwc, w_hwio, bn_scale, bn_bias, k=K)
    assert out.shape == (N, H, W, C2) and out.dtype == jnp.bfloat16
    out32 = out.astype(jnp.float32)
    err = float(jnp.max(jnp.abs(out32 - ref)))
    assert jnp.allclose(out32, ref, atol=2e-2, rtol=2e-2), f"k=3 mismatch (max err {err})"

    # k=1 pointwise Conv (the module default k) exercises the no-halo / single-tap path.
    w1_oihw = 0.1 * jax.random.normal(kw1, (C2, C1, 1, 1), jnp.float32)
    w1_hwio = jnp.transpose(w1_oihw, (2, 3, 1, 0))
    out1 = jax.block_until_ready(conv_bn_silu(x_nhwc, w1_hwio, bn_scale, bn_bias, k=1))
    ref1 = reference(x_nhwc, w1_hwio, bn_scale, bn_bias, k=1)
    err1 = float(jnp.max(jnp.abs(out1.astype(jnp.float32) - ref1)))
    assert jnp.allclose(out1.astype(jnp.float32), ref1, atol=2e-2, rtol=2e-2), \
        f"k=1 mismatch (max err {err1})"

    print("KERNEL_OK")
</pallas_src>

<mosaic_0001>
module attributes {stable_mosaic.version = 11 : i64} {
  func.func @conv_bn_silu_kernel(%arg0: i32, %arg1: i32, %arg2: memref<1x18x18x4xbf16, #tpu.memory_space<vmem>>, %arg3: memref<3x12x8xbf16, #tpu.memory_space<vmem>>, %arg4: memref<1x8xf32, #tpu.memory_space<vmem>>, %arg5: memref<1x256x8xbf16, #tpu.memory_space<vmem>>) attributes {dimension_semantics = [#tpu.dimension_semantics<parallel>, #tpu.dimension_semantics<parallel>], iteration_bounds = array<i64: 2, 1>, scalar_prefetch = 0 : i64, scratch_operands = 0 : i64, tpu.core_type = #tpu.core_type<tc>, window_params = [{transform_indices = @transform_0, window_bounds = array<i64: 1, 18, 18, 4>}, {transform_indices = @transform_1, window_bounds = array<i64: 3, 12, 8>}, {transform_indices = @transform_2, window_bounds = array<i64: 1, 8>}, {transform_indices = @transform_3, window_bounds = array<i64: 1, 256, 8>}]} {
    %c0 = arith.constant 0 : index
    %c0_0 = arith.constant 0 : index
    %c0_1 = arith.constant 0 : index
    %c0_2 = arith.constant 0 : index
    %0 = vector.load %arg2[%c0, %c0_0, %c0_1, %c0_2] : memref<1x18x18x4xbf16, #tpu.memory_space<vmem>>, vector<1x18x18x4xbf16>
    %1 = vector.shape_cast %0 : vector<1x18x18x4xbf16> to vector<18x18x4xbf16>
    %2 = vector.extract_strided_slice %1 {offsets = [0, 0, 0], sizes = [16, 18, 4], strides = [1, 1, 1]} : vector<18x18x4xbf16> to vector<16x18x4xbf16>
    %3 = vector.extract_strided_slice %2 {offsets = [0, 0, 0], sizes = [16, 16, 4], strides = [1, 1, 1]} : vector<16x18x4xbf16> to vector<16x16x4xbf16>
    %4 = vector.shape_cast %3 : vector<16x16x4xbf16> to vector<256x4xbf16>
    %5 = vector.extract_strided_slice %2 {offsets = [0, 1, 0], sizes = [16, 16, 4], strides = [1, 1, 1]} : vector<16x18x4xbf16> to vector<16x16x4xbf16>
    %6 = vector.shape_cast %5 : vector<16x16x4xbf16> to vector<256x4xbf16>
    %7 = vector.extract_strided_slice %2 {offsets = [0, 2, 0], sizes = [16, 16, 4], strides = [1, 1, 1]} : vector<16x18x4xbf16> to vector<16x16x4xbf16>
    %8 = vector.shape_cast %7 : vector<16x16x4xbf16> to vector<256x4xbf16>
    %9 = tpu.concatenate %4, %6, %8 in 1 : vector<256x4xbf16>, vector<256x4xbf16>, vector<256x4xbf16> -> vector<256x12xbf16>
    %c0_3 = arith.constant 0 : index
    %c0_4 = arith.constant 0 : index
    %c0_5 = arith.constant 0 : index
    %10 = vector.load %arg3[%c0_3, %c0_4, %c0_5] : memref<3x12x8xbf16, #tpu.memory_space<vmem>>, vector<1x12x8xbf16>
    %11 = vector.shape_cast %10 : vector<1x12x8xbf16> to vector<12x8xbf16>
    %cst = arith.constant dense<0.000000e+00> : vector<256x8xf32>
    %12 = tpu.matmul %9, %11, %cst {dimension_numbers = #tpu.dot_dimension_numbers<[1], [0], [0], [1], [0, 0, 1, 1], [], []>} : vector<256x12xbf16>, vector<12x8xbf16>, vector<256x8xf32> -> vector<256x8xf32>
    %13 = vector.extract_strided_slice %1 {offsets = [1, 0, 0], sizes = [16, 18, 4], strides = [1, 1, 1]} : vector<18x18x4xbf16> to vector<16x18x4xbf16>
    %14 = vector.extract_strided_slice %13 {offsets = [0, 0, 0], sizes = [16, 16, 4], strides = [1, 1, 1]} : vector<16x18x4xbf16> to vector<16x16x4xbf16>
    %15 = vector.shape_cast %14 : vector<16x16x4xbf16> to vector<256x4xbf16>
    %16 = vector.extract_strided_slice %13 {offsets = [0, 1, 0], sizes = [16, 16, 4], strides = [1, 1, 1]} : vector<16x18x4xbf16> to vector<16x16x4xbf16>
    %17 = vector.shape_cast %16 : vector<16x16x4xbf16> to vector<256x4xbf16>
    %18 = vector.extract_strided_slice %13 {offsets = [0, 2, 0], sizes = [16, 16, 4], strides = [1, 1, 1]} : vector<16x18x4xbf16> to vector<16x16x4xbf16>
    %19 = vector.shape_cast %18 : vector<16x16x4xbf16> to vector<256x4xbf16>
    %20 = tpu.concatenate %15, %17, %19 in 1 : vector<256x4xbf16>, vector<256x4xbf16>, vector<256x4xbf16> -> vector<256x12xbf16>
    %c1 = arith.constant 1 : index
    %c0_6 = arith.constant 0 : index
    %c0_7 = arith.constant 0 : index
    %21 = vector.load %arg3[%c1, %c0_6, %c0_7] : memref<3x12x8xbf16, #tpu.memory_space<vmem>>, vector<1x12x8xbf16>
    %22 = vector.shape_cast %21 : vector<1x12x8xbf16> to vector<12x8xbf16>
    %cst_8 = arith.constant dense<0.000000e+00> : vector<256x8xf32>
    %23 = tpu.matmul %20, %22, %cst_8 {dimension_numbers = #tpu.dot_dimension_numbers<[1], [0], [0], [1], [0, 0, 1, 1], [], []>} : vector<256x12xbf16>, vector<12x8xbf16>, vector<256x8xf32> -> vector<256x8xf32>
    %24 = arith.addf %12, %23 : vector<256x8xf32>
    %25 = vector.extract_strided_slice %1 {offsets = [2, 0, 0], sizes = [16, 18, 4], strides = [1, 1, 1]} : vector<18x18x4xbf16> to vector<16x18x4xbf16>
    %26 = vector.extract_strided_slice %25 {offsets = [0, 0, 0], sizes = [16, 16, 4], strides = [1, 1, 1]} : vector<16x18x4xbf16> to vector<16x16x4xbf16>
    %27 = vector.shape_cast %26 : vector<16x16x4xbf16> to vector<256x4xbf16>
    %28 = vector.extract_strided_slice %25 {offsets = [0, 1, 0], sizes = [16, 16, 4], strides = [1, 1, 1]} : vector<16x18x4xbf16> to vector<16x16x4xbf16>
    %29 = vector.shape_cast %28 : vector<16x16x4xbf16> to vector<256x4xbf16>
    %30 = vector.extract_strided_slice %25 {offsets = [0, 2, 0], sizes = [16, 16, 4], strides = [1, 1, 1]} : vector<16x18x4xbf16> to vector<16x16x4xbf16>
    %31 = vector.shape_cast %30 : vector<16x16x4xbf16> to vector<256x4xbf16>
    %32 = tpu.concatenate %27, %29, %31 in 1 : vector<256x4xbf16>, vector<256x4xbf16>, vector<256x4xbf16> -> vector<256x12xbf16>
    %c2 = arith.constant 2 : index
    %c0_9 = arith.constant 0 : index
    %c0_10 = arith.constant 0 : index
    %33 = vector.load %arg3[%c2, %c0_9, %c0_10] : memref<3x12x8xbf16, #tpu.memory_space<vmem>>, vector<1x12x8xbf16>
    %34 = vector.shape_cast %33 : vector<1x12x8xbf16> to vector<12x8xbf16>
    %cst_11 = arith.constant dense<0.000000e+00> : vector<256x8xf32>
    %35 = tpu.matmul %32, %34, %cst_11 {dimension_numbers = #tpu.dot_dimension_numbers<[1], [0], [0], [1], [0, 0, 1, 1], [], []>} : vector<256x12xbf16>, vector<12x8xbf16>, vector<256x8xf32> -> vector<256x8xf32>
    %36 = arith.addf %24, %35 : vector<256x8xf32>
    %c0_12 = arith.constant 0 : index
    %c0_13 = arith.constant 0 : index
    %37 = vector.load %arg4[%c0_12, %c0_13] : memref<1x8xf32, #tpu.memory_space<vmem>>, vector<1x8xf32>
    %38 = vector.shape_cast %37 : vector<1x8xf32> to vector<8xf32>
    %39 = vector.shape_cast %38 : vector<8xf32> to vector<1x8xf32>
    %40 = vector.broadcast %39 : vector<1x8xf32> to vector<256x8xf32>
    %41 = arith.addf %36, %40 : vector<256x8xf32>
    %cst_14 = arith.constant 0.000000e+00 : f32
    %42 = vector.broadcast %cst_14 : f32 to vector<256x8xf32>
    %43 = arith.subf %42, %41 : vector<256x8xf32>
    %44 = math.exp %43 : vector<256x8xf32>
    %cst_15 = arith.constant 1.000000e+00 : f32
    %45 = vector.broadcast %cst_15 : f32 to vector<256x8xf32>
    %46 = arith.addf %45, %44 : vector<256x8xf32>
    %47 = tpu.reciprocal %46 {approx = true} : vector<256x8xf32> -> vector<256x8xf32>
    %48 = arith.mulf %41, %47 : vector<256x8xf32>
    %49 = arith.truncf %48 : vector<256x8xf32> to vector<256x8xbf16>
    %c0_16 = arith.constant 0 : index
    %c0_17 = arith.constant 0 : index
    %c0_18 = arith.constant 0 : index
    %50 = vector.load %arg5[%c0_16, %c0_17, %c0_18] : memref<1x256x8xbf16, #tpu.memory_space<vmem>>, vector<1x256x8xbf16>
    %51 = vector.shape_cast %50 : vector<1x256x8xbf16> to vector<256x8xbf16>
    %52 = vector.shape_cast %49 : vector<256x8xbf16> to vector<1x256x8xbf16>
    tpu.vector_store %arg5[%c0_16, %c0_17, %c0_18], %52 {strides = array<i32>} : memref<1x256x8xbf16, #tpu.memory_space<vmem>>, vector<1x256x8xbf16>,
    return
  }
  func.func @transform_0(%arg0: i32, %arg1: i32) -> (i32, i32, i32, i32) {
    %c0_i32 = arith.constant 0 : i32
    %c0_i32_0 = arith.constant 0 : i32
    %c0_i32_1 = arith.constant 0 : i32
    %c0_i32_2 = arith.constant 0 : i32
    return %arg0, %c0_i32, %c0_i32_0, %c0_i32_1 : i32, i32, i32, i32
  }
  func.func @transform_1(%arg0: i32, %arg1: i32) -> (i32, i32, i32) {
    %c0_i32 = arith.constant 0 : i32
    %c0_i32_0 = arith.constant 0 : i32
    %c0_i32_1 = arith.constant 0 : i32
    return %c0_i32, %c0_i32_0, %arg1 : i32, i32, i32
  }
  func.func @transform_2(%arg0: i32, %arg1: i32) -> (i32, i32) {
    %c0_i32 = arith.constant 0 : i32
    %c0_i32_0 = arith.constant 0 : i32
    return %c0_i32, %arg1 : i32, i32
  }
  func.func @transform_3(%arg0: i32, %arg1: i32) -> (i32, i32, i32) {
    %c0_i32 = arith.constant 0 : i32
    %c0_i32_0 = arith.constant 0 : i32
    return %arg0, %c0_i32, %arg1 : i32, i32, i32
  }
}

</mosaic_0001>

<bundles_post_ra>
// kernel: conv_bn_silu.1
= control target key start
LH: loop header
LB: loop body
LE: loop exit
PB: predicated region body
PF: predicated region fallthrough
CT: control target
= control target key end

     0   :  { %s2895_s12 = smov 0   ;;  %s2897_s13 = smov 0   ;;  %s3894_s0 = inlined_call_operand.vmem [shape: bf16[2,18,18,4], index: 0, kind: input, shape index: {}]   ;;  %s3895_s1 = inlined_call_operand.vmem [shape: bf16[3,12,8], index: 1, kind: input, shape index: {}]   ;;  %s3896_s2 = inlined_call_operand.vmem [shape: f32[1,8], index: 2, kind: input, shape index: {}]   ;;  %s3897_s3 = inlined_call_operand.vmem [shape: bf16[2,256,8], index: 3, kind: output, shape index: {}]  }
   0x1   :  { %s2899_s14 = smov 0  }
   0x2 LB: > { %s25_s15 = sadd.s32 1, %s2867_s13  ;;  %p2309_p0 = scmp.ge.s32.totalorder %s2871_s14, 1  ;;  %s2871_s14 = sphi %s2899_s14, %s13_s14   ;;  %s2867_s13 = sphi %s2897_s13, %s3903_s13   ;;  %s2863_s12 = sphi %s2895_s12, %s3902_s12  }
   0x3   : > { %p27_p1 = scmp.ge.s32.totalorder %s25_s15, 2  ;;  %p168_p2 = scmp.lt.s32.totalorder %s2871_s14, 3 }
   0x5   : > { %s3905_s15 = smov (%p27_p1, %s25_s15), 0  ;;  %p169_p3 = pnand %p2309_p0, %p168_p2 }
   0x6   : > { %p202_p4 = scmp.lt.s32.totalorder (!%p169_p3), %s2863_s12, 1  ;;  %s2873_s20 = smov (!%p169_p3), 8  }
   0x7   : > { %172 = sbr.rel (%p169_p3) target bundleno = 557 (0x22d), region = 32  ;;  %s2874_s21 = smov (!%p169_p3), 4  }
   0xc   : > { %vm712_vm0 = vcmask 1042432   ;;  %s3907_s12 = smov (!%p202_p4, %s2863_s12), 1  ;;  %vm713_vm1 = vcmask 1046532   ;;  %vm277_vm3 = vsmask.f32 3328  ;;  %vm1212_vm6 = vcmask 1045504  }
   0xd   : > { %s2667_s16 = smul.u32 216, %s3907_s12  ;;  %vm2921_vm2 = vmor %vm712_vm0, %vm713_vm1  ;;  %vm278_vm4 = vsmask.f32 7440  ;;  %vm1035_vm7 = vcmask 31744   ;;  %vm1084_vm8 = vcmask 64512   ;;  %vm1179_vm9 = vcmask 97280  }
   0xe   : > { %vm2991_vm5 = vmor %vm277_vm3, %vm278_vm4  ;;  %vm2165_vm10 = vcmask 60416   ;;  %s2475_s30 = sshll.u32 %s3907_s12, 7 }
   0xf   : > { %s2919_s19 = scalar_lea.vmem %s3894_s0, %s2667_s16  ;;  %s3720_s6 = scalar_lea.vmem %s3897_s3, %s2475_s30 }
  0x10   : > { %v2926_v1 = vld [vmem:[%s2919_s19 + $0x78] sm:$0xf]  ;;  %v2929_v2 = vld [vmem:[%s2919_s19 + $0x7c] sm:$0xf]  ;;  %v2932_v3 = vld [vmem:[%s2919_s19 + $0x80] sm:$0x1] }
  0x11   : > { %v540_v4 = vshll.u32 %v2932_v3, 16  ;;  %v2323_v5 = vrot.slane %v2926_v1, 9  ;;  %v787_v6 = vrot.slane %v2929_v2, 5  ;;  %v790_v7 = vrot.slane %v2932_v3, 5  ;;  %v2939_v8 = vld [vmem:[%s2919_s19 + $0x6c] sm:$0xf] }
  0x12   : > { %v2942_v9 = vld [vmem:[%s2919_s19 + $0x70] sm:$0xf]  ;;  %v252_v10 = vld [vmem:[%s2919_s19 + $0x74] sm:$0x1]  ;;  %v2322_v11 = vrot.slane %v2939_v8, 9  ;;  %v497_v12 = vshrl.u32 %v2939_v8, 16 }
  0x13   : > { %v788_v13 = vsel %vm2921_vm2, %v2323_v5, %v787_v6  ;;  %v789_v14 = vrot.slane %v787_v6, 4  ;;  %v516_v15 = vshll.u32 %v252_v10, 16  ;;  %v780_v16 = vrot.slane %v2942_v9, 5  ;;  %v2951_v17 = vld [vmem:[%s2919_s19 + $0x18] sm:$0xf] }
  0x14   : > { %v783_v18 = vrot.slane %v252_v10, 5  ;;  %v2954_v19 = vld [vmem:[%s2919_s19 + $0x1c] sm:$0xf]  ;;  %v2957_v20 = vld [vmem:[%s2919_s19 + $0x20] sm:$0x1]  ;;  %v2315_v21 = vrot.slane %v2951_v17, 9  ;;  %v2338_v22 = vcombine.low %v2939_v8, %v2942_v9 }
  0x15   : > { %v791_v23 = vsel %vm2921_vm2, %v789_v14, %v790_v7  ;;  %v781_v24 = vsel %vm2921_vm2, %v2322_v11, %v780_v16  ;;  %v782_v25 = vrot.slane %v780_v16, 4  ;;  %v731_v26 = vrot.slane %v2954_v19, 5  ;;  %v226_v27 = vld [vmem:[%s2919_s19 + $0xc] sm:$0xf]  ;;  %v227_v28 = vld [vmem:[%s2919_s19 + $0x10] sm:$0xf] }
  0x16   : > { %v2371_v29 = vcombine.low %v788_v13, %v791_v23  ;;  %v734_v30 = vrot.slane %v2957_v20, 5  ;;  %v228_v31 = vld [vmem:[%s2919_s19 + $0x14] sm:$0x1]  ;;  %v2314_v32 = vrot.slane %v226_v27, 9  ;;  %v724_v33 = vrot.slane %v227_v28, 5 }
  0x17   : > { %v784_v34 = vsel %vm2921_vm2, %v782_v25, %v783_v18  ;;  %v732_v35 = vsel %vm2921_vm2, %v2315_v21, %v731_v26  ;;  %v733_v36 = vrot.slane %v731_v26, 4  ;;  %v727_v37 = vrot.slane %v228_v31, 5 }
  0x18   : > { %1023 = vrot.lane.b32.xlu0 %v2371_v29, %s2873_s20  ;;  %v2370_v38 = vcombine.low %v781_v24, %v784_v34  ;;  %v725_v39 = vsel %vm2921_vm2, %v2314_v32, %v724_v33  ;;  %v726_v40 = vrot.slane %v724_v33, 4  ;;  %v499_v41 = vrot.slane %v497_v12, 4  ;;  %v3013_v34 = vld [vmem:[%s2919_s19 + $0x84] sm:$0xf] }
  0x19   : > { %v735_v42 = vsel %vm2921_vm2, %v733_v36, %v734_v30  ;;  %v500_v43 = vshll.u32 %v2939_v8, 16  ;;  %v506_v44 = vshll.u32 %v2942_v9, 16  ;;  %v510_v45 = vshrl.u32 %v2942_v9, 16 }
  0x1a   : > { %1021 = vrot.lane.b32.xlu1 %v2370_v38, %s2873_s20  ;;  %v2363_v46 = vcombine.low %v732_v35, %v735_v42  ;;  %v728_v47 = vsel %vm2921_vm2, %v726_v40, %v727_v37  ;;  %v518_v48 = vrot.slane %v516_v15, 5  ;;  %v305_v49 = vshrl.u32 %v226_v27, 16 }
  0x1b   : > { %v2362_v50 = vcombine.low %v725_v39, %v728_v47  ;;  %v502_v51 = vrot.slane %v500_v43, 5  ;;  %v508_v52 = vrot.slane %v506_v44, 5  ;;  %v512_v53 = vrot.slane %v510_v45, 4  ;;  %v3024_v45 = vld [vmem:[%s2919_s19 + $0x8c] sm:$0x1] }
  0x1c   : > { %v307_v54 = vrot.slane %v305_v49, 4  ;;  %v308_v55 = vshll.u32 %v226_v27, 16  ;;  %v314_v56 = vshll.u32 %v227_v28, 16  ;;  %v318_v57 = vshrl.u32 %v227_v28, 16 }
  0x1d   : > { %1005 = vrot.lane.b32.xlu0 %v2362_v50, %s2873_s20  ;;  %v503_v58 = vor.u32 %v502_v51, %v499_v41  ;;  %v513_v59 = vor.u32 %v512_v53, %v508_v52  ;;  %v324_v60 = vshll.u32 %v228_v31, 16  ;;  %v521_v61 = vshrl.u32 %v2926_v1, 16 }
  0x1e   : > { %1007 = vrot.lane.b32.xlu1 %v2363_v46, %s2873_s20  ;;  %v310_v63 = vrot.slane %v308_v55, 5  ;;  %v316_v5 = vrot.slane %v314_v56, 5  ;;  %v320_v6 = vrot.slane %v318_v57, 4  ;;  %v524_v7 = vshll.u32 %v2926_v1, 16  ;;  %v3036_v55 = vld [vmem:[%s2919_s19 + $0x94] sm:$0xf] }
  0x1f   : > { %v504_v10 = vrot.slane %v503_v58, 4  ;;  %v514_v11 = vrot.slane %v513_v59, 4  ;;  %v326_v12 = vrot.slane %v324_v60, 5  ;;  %v523_v13 = vrot.slane %v521_v61, 4 }
  0x20   : > { %v311_v14 = vor.u32 %v310_v63, %v307_v54  ;;  %v321_v15 = vor.u32 %v320_v6, %v316_v5  ;;  %v526_v16 = vrot.slane %v524_v7, 5  ;;  %v530_v18 = vshll.u32 %v2929_v2, 16 }
  0x21   : > { %v509_v21 = vsel %vm2991_vm5, %v504_v10, %v508_v52  ;;  %v519_v23 = vsel %vm2991_vm5, %v514_v11, %v518_v48  ;;  %v534_v24 = vshrl.u32 %v2929_v2, 16  ;;  %v542_v1 = vrot.slane %v540_v4, 5  ;;  %v3044_v10 = vld [vmem:[%s2919_s19 + $0x98] sm:$0x1] }
  0x22   : > { %v2354_v25 = vcombine.low %v509_v21, %v519_v23  ;;  %v312_v26 = vrot.slane %v311_v14, 4  ;;  %v322_v27 = vrot.slane %v321_v15, 4  ;;  %v527_v28 = vor.u32 %v526_v16, %v523_v13 }
  0x23   : > { %v532_v29 = vrot.slane %v530_v18, 5  ;;  %v536_v30 = vrot.slane %v534_v24, 4  ;;  %v329_v31 = vshrl.u32 %v2951_v17, 16  ;;  %v332_v32 = vshll.u32 %v2951_v17, 16  ;;  %v3016_v17 = vld [vmem:[%s2919_s19 + $0x88] sm:$0xf] }
  0x24   : > { %941 = vrot.lane.b32.xlu0 %v2354_v25, %s2874_s21  ;;  %v317_v2 = vsel %vm2991_vm5, %v312_v26, %v316_v5  ;;  %v327_v3 = vsel %vm2991_vm5, %v322_v27, %v326_v12  ;;  %v528_v4 = vrot.slane %v527_v28, 4  ;;  %v338_v33 = vshll.u32 %v2954_v19, 16  ;;  %v3055_v28 = vld [vmem:[%s2919_s19 + $0x24] sm:$0xf] }
  0x25   : > { %v2346_v35 = vcombine.low %v317_v2, %v327_v3  ;;  %v537_v36 = vor.u32 %v536_v30, %v532_v29  ;;  %v331_v37 = vrot.slane %v329_v31, 4  ;;  %v334_v38 = vrot.slane %v332_v32, 5  ;;  %v3062_v2 = vld [vmem:[%s2919_s19 + $0x28] sm:$0xf] }
  0x26   : > { %v533_v39 = vsel %vm2991_vm5, %v528_v4, %v532_v29  ;;  %v340_v40 = vrot.slane %v338_v33, 5  ;;  %v342_v41 = vshrl.u32 %v2954_v19, 16  ;;  %v348_v42 = vshll.u32 %v2957_v20, 16  ;;  %v3031_v19 = vld [vmem:[%s2919_s19 + $0x90] sm:$0xf] }
  0x27   : > { %925 = vrot.lane.b32.xlu1 %v2346_v35, %s2874_s21  ;;  %v538_v43 = vrot.slane %v537_v36, 4  ;;  %v335_v44 = vor.u32 %v334_v38, %v331_v37  ;;  %v545_v46 = vshrl.u32 %v3013_v34, 16  ;;  %v548_v47 = vshll.u32 %v3013_v34, 16  ;;  %v3067_v36 = vld [vmem:[%s2919_s19 + $0x2c] sm:$0x1] }
  0x28   : > { %v344_v48 = vrot.slane %v342_v41, 4  ;;  %v350_v49 = vrot.slane %v348_v42, 5  ;;  %v554_v50 = vshll.u32 %v3016_v17, 16  ;;  %v558_v51 = vshrl.u32 %v3016_v17, 16 }
  0x29   : > { %v543_v20 = vsel %vm2991_vm5, %v538_v43, %v542_v1  ;;  %v336_v52 = vrot.slane %v335_v44, 4  ;;  %v547_v53 = vrot.slane %v545_v46, 4  ;;  %v550_v54 = vrot.slane %v548_v47, 5 }
  0x2a   : > { %v2355_v56 = vcombine.low %v533_v39, %v543_v20  ;;  %v345_v57 = vor.u32 %v344_v48, %v340_v40  ;;  %v556_v58 = vrot.slane %v554_v50, 5  ;;  %v560_v59 = vrot.slane %v558_v51, 4 }
  0x2b   : > { %v341_v60 = vsel %vm2991_vm5, %v336_v52, %v340_v40  ;;  %v551_v61 = vor.u32 %v550_v54, %v547_v53  ;;  %v564_v63 = vshll.u32 %v3024_v45, 16  ;;  %v569_v5 = vshrl.u32 %v3031_v19, 16  ;;  %v3087_v53 = vld [vmem:[%s2919_s19 + $0x34] sm:$0xf] }
  0x2c   : > { %943 = vrot.lane.b32.xlu0 %v2355_v56, %s2874_s21  ;;  %v346_v6 = vrot.slane %v345_v57, 4  ;;  %v561_v7 = vor.u32 %v560_v59, %v556_v58  ;;  %v572_v11 = vshll.u32 %v3031_v19, 16  ;;  %v578_v12 = vshll.u32 %v3036_v55, 16 }
  0x2d   : > { %v552_v13 = vrot.slane %v551_v61, 4  ;;  %v566_v14 = vrot.slane %v564_v63, 5  ;;  %v571_v15 = vrot.slane %v569_v5, 4  ;;  %v582_v16 = vshrl.u32 %v3036_v55, 16 }
  0x2e   : > { %v351_v18 = vsel %vm2991_vm5, %v346_v6, %v350_v49  ;;  %v562_v21 = vrot.slane %v561_v7, 4  ;;  %v574_v23 = vrot.slane %v572_v11, 5  ;;  %v580_v24 = vrot.slane %v578_v12, 5  ;;  %v3082_v49 = vld [vmem:[%s2919_s19 + $0x30] sm:$0xf] }
  0x2f   : > { %v2347_v1 = vcombine.low %v341_v60, %v351_v18  ;;  %v557_v25 = vsel %vm2991_vm5, %v552_v13, %v556_v58  ;;  %v584_v26 = vrot.slane %v582_v16, 4  ;;  %v588_v27 = vshll.u32 %v3044_v10, 16  ;;  %v237_v6 = vld [vmem:[%s2919_s19 + $0x38] sm:$0x1] }
  0x30   : > { %v567_v29 = vsel %vm2991_vm5, %v562_v21, %v566_v14  ;;  %v575_v30 = vor.u32 %v574_v23, %v571_v15  ;;  %v2324_v31 = vrot.slane %v3013_v34, 9  ;;  %v794_v32 = vrot.slane %v3016_v17, 5 }
  0x31   : > { %927 = vrot.lane.b32.xlu1 %v2347_v1, %s2874_s21  ;;  %v2356_v3 = vcombine.low %v557_v25, %v567_v29  ;;  %v585_v4 = vor.u32 %v584_v26, %v580_v24  ;;  %v590_v33 = vrot.slane %v588_v27, 5  ;;  %v797_v35 = vrot.slane %v3024_v45, 5 }
  0x32   : > { %v576_v37 = vrot.slane %v575_v30, 4  ;;  %v795_v38 = vsel %vm2921_vm2, %v2324_v31, %v794_v32  ;;  %v796_v39 = vrot.slane %v794_v32, 4  ;;  %v353_v40 = vshrl.u32 %v3055_v28, 16  ;;  %v3109_v32 = vld [vmem:[%s2919_s19 + $0x9c] sm:$0xf] }
  0x33   : > { %945 = vrot.lane.b32.xlu0 %v2356_v3, %s2874_s21  ;;  %v586_v41 = vrot.slane %v585_v4, 4  ;;  %v356_v42 = vshll.u32 %v3055_v28, 16  ;;  %v362_v43 = vshll.u32 %v3062_v2, 16  ;;  %v366_v44 = vshrl.u32 %v3062_v2, 16 }
  0x34   : > { %v581_v45 = vsel %vm2991_vm5, %v576_v37, %v580_v24  ;;  %v798_v46 = vsel %vm2921_vm2, %v796_v39, %v797_v35  ;;  %v355_v47 = vrot.slane %v353_v40, 4  ;;  %v372_v48 = vshll.u32 %v3067_v36, 16 }
  0x35   : > { %v591_v50 = vsel %vm2991_vm5, %v586_v41, %v590_v33  ;;  %v2372_v51 = vcombine.low %v795_v38, %v798_v46  ;;  %v358_v20 = vrot.slane %v356_v42, 5  ;;  %v364_v52 = vrot.slane %v362_v43, 5 }
  0x36   : > { %v2357_v54 = vcombine.low %v581_v45, %v591_v50  ;;  %v368_v56 = vrot.slane %v366_v44, 4  ;;  %v374_v57 = vrot.slane %v372_v48, 5  ;;  %v2325_v58 = vrot.slane %v3031_v19, 9  ;;  %v3120_v44 = vld [vmem:[%s2919_s19 + $0xa0] sm:$0xf] }
  0x37   : > { %1025 = vrot.lane.b32.xlu0 %v2372_v51, %s2873_s20  ;;  %v359_v59 = vor.u32 %v358_v20, %v355_v47  ;;  %v801_v60 = vrot.slane %v3036_v55, 5  ;;  %v804_v61 = vrot.slane %v3044_v10, 5  ;;  %v377_v63 = vshrl.u32 %v3082_v49, 16  ;;  %v264_v50 = vld [vmem:[%s2919_s19 + $0xa4] sm:$0x1] }
  0x38   : > { %947 = vrot.lane.b32.xlu1 %v2357_v54, %s2874_s21  ;;  %v369_v5 = vor.u32 %v368_v56, %v364_v52  ;;  %v380_v7 = vshll.u32 %v3082_v49, 16  ;;  %v386_v11 = vshll.u32 %v3087_v53, 16  ;;  %v390_v12 = vshrl.u32 %v3087_v53, 16  ;;  %v3131_v51 = vld [vmem:[%s2919_s19 + $0xa8] sm:$0xf] }
  0x39   : > { %v360_v13 = vrot.slane %v359_v59, 4  ;;  %v802_v14 = vsel %vm2921_vm2, %v2325_v58, %v801_v60  ;;  %v803_v15 = vrot.slane %v801_v60, 4  ;;  %v379_v16 = vrot.slane %v377_v63, 4 }
  0x3a   : > { %v370_v10 = vrot.slane %v369_v5, 4  ;;  %v382_v18 = vrot.slane %v380_v7, 5  ;;  %v388_v21 = vrot.slane %v386_v11, 5  ;;  %v392_v23 = vrot.slane %v390_v12, 4  ;;  %v3145_v7 = vld [vmem:[%s2919_s19 + $0xb0] sm:$0x1] }
  0x3b   : > { %v365_v24 = vsel %vm2991_vm5, %v360_v13, %v364_v52  ;;  %v805_v1 = vsel %vm2921_vm2, %v803_v15, %v804_v61  ;;  %v396_v25 = vshll.u32 %v237_v6, 16  ;;  %v2316_v26 = vrot.slane %v3055_v28, 9 }
  0x3c   : > { %v375_v27 = vsel %vm2991_vm5, %v370_v10, %v374_v57  ;;  %v2373_v29 = vcombine.low %v802_v14, %v805_v1  ;;  %v383_v30 = vor.u32 %v382_v18, %v379_v16  ;;  %v393_v31 = vor.u32 %v392_v23, %v388_v21  ;;  %v3137_v57 = vld [vmem:[%s2919_s19 + $0xac] sm:$0xf] }
  0x3d   : > { %v2348_v3 = vcombine.low %v365_v24, %v375_v27  ;;  %v398_v4 = vrot.slane %v396_v25, 5  ;;  %v738_v33 = vrot.slane %v3062_v2, 5  ;;  %v741_v35 = vrot.slane %v3067_v36, 5 }
  0x3e   : > { %1027 = vrot.lane.b32.xlu0 %v2373_v29, %s2873_s20  ;;  %v384_v37 = vrot.slane %v383_v30, 4  ;;  %v394_v38 = vrot.slane %v393_v31, 4  ;;  %v2317_v39 = vrot.slane %v3082_v49, 9  ;;  %v745_v40 = vrot.slane %v3087_v53, 5  ;;  %v3157_v31 = vld [vmem:[%s2919_s19 + $0x3c] sm:$0xf] }
  0x3f   : > { %929 = vrot.lane.b32.xlu1 %v2348_v3, %s2874_s21  ;;  %v739_v41 = vsel %vm2921_vm2, %v2316_v26, %v738_v33  ;;  %v740_v42 = vrot.slane %v738_v33, 4  ;;  %v748_v43 = vrot.slane %v237_v6, 5  ;;  %v593_v36 = vshrl.u32 %v3109_v32, 16 }
  0x40   : > { %v389_v45 = vsel %vm2991_vm5, %v384_v37, %v388_v21  ;;  %v399_v46 = vsel %vm2991_vm5, %v394_v38, %v398_v4  ;;  %v746_v47 = vsel %vm2921_vm2, %v2317_v39, %v745_v40  ;;  %v747_v48 = vrot.slane %v745_v40, 4  ;;  %v3160_v37 = vld [vmem:[%s2919_s19 + $0x40] sm:$0xf] }
  0x41   : > { %v2349_v20 = vcombine.low %v389_v45, %v399_v46  ;;  %v742_v52 = vsel %vm2921_vm2, %v740_v42, %v741_v35  ;;  %v595_v54 = vrot.slane %v593_v36, 4  ;;  %v596_v56 = vshll.u32 %v3109_v32, 16  ;;  %v3169_v36 = vld [vmem:[%s2919_s19 + $0x44] sm:$0x1] }
  0x42   : > { %v2364_v58 = vcombine.low %v739_v41, %v742_v52  ;;  %v749_v59 = vsel %vm2921_vm2, %v747_v48, %v748_v43  ;;  %v602_v60 = vshll.u32 %v3120_v44, 16  ;;  %v606_v61 = vshrl.u32 %v3120_v44, 16 }
  0x43   : > { %931 = vrot.lane.b32.xlu1 %v2349_v20, %s2874_s21  ;;  %v2365_v63 = vcombine.low %v746_v47, %v749_v59  ;;  %v598_v5 = vrot.slane %v596_v56, 5  ;;  %v612_v6 = vshll.u32 %v264_v50, 16  ;;  %v617_v11 = vshrl.u32 %v3131_v51, 16  ;;  %v3179_v59 = vld [vmem:[%s2919_s19 + $0x48] sm:$0xf] }
  0x44   : > { %1009 = vrot.lane.b32.xlu0 %v2364_v58, %s2873_s20  ;;  %v604_v12 = vrot.slane %v602_v60, 5  ;;  %v608_v13 = vrot.slane %v606_v61, 4  ;;  %v620_v14 = vshll.u32 %v3131_v51, 16  ;;  %v626_v15 = vshll.u32 %v3137_v57, 16 }
  0x45   : > { %v599_v16 = vor.u32 %v598_v5, %v595_v54  ;;  %v614_v10 = vrot.slane %v612_v6, 5  ;;  %v619_v18 = vrot.slane %v617_v11, 4  ;;  %v630_v21 = vshrl.u32 %v3137_v57, 16 }
  0x46   : > { %v609_v23 = vor.u32 %v608_v13, %v604_v12  ;;  %v622_v24 = vrot.slane %v620_v14, 5  ;;  %v628_v1 = vrot.slane %v626_v15, 5  ;;  %v636_v25 = vshll.u32 %v3145_v7, 16  ;;  %v3189_v14 = vld [vmem:[%s2919_s19 + $0x4c] sm:$0xf] }
  0x47   : > { %1011 = vrot.lane.b32.xlu1 %v2365_v63, %s2873_s20  ;;  %v600_v26 = vrot.slane %v599_v16, 4  ;;  %v632_v27 = vrot.slane %v630_v21, 4  ;;  %v2326_v29 = vrot.slane %v3109_v32, 9  ;;  %v808_v30 = vrot.slane %v3120_v44, 5 }
  0x48   : > { %v610_v3 = vrot.slane %v609_v23, 4  ;;  %v623_v4 = vor.u32 %v622_v24, %v619_v18  ;;  %v638_v33 = vrot.slane %v636_v25, 5  ;;  %v811_v35 = vrot.slane %v264_v50, 5  ;;  %v243_v18 = vld [vmem:[%s2919_s19 + $0x50] sm:$0x1] }
  0x49   : > { %v605_v38 = vsel %vm2991_vm5, %v600_v26, %v604_v12  ;;  %v633_v39 = vor.u32 %v632_v27, %v628_v1  ;;  %v809_v40 = vsel %vm2921_vm2, %v2326_v29, %v808_v30  ;;  %v810_v41 = vrot.slane %v808_v30, 4 }
  0x4a   : > { %v615_v42 = vsel %vm2991_vm5, %v610_v3, %v614_v10  ;;  %v624_v43 = vrot.slane %v623_v4, 4  ;;  %v401_v45 = vshrl.u32 %v3157_v31, 16  ;;  %v404_v46 = vshll.u32 %v3157_v31, 16 }
  0x4b   : > { %v2358_v47 = vcombine.low %v605_v38, %v615_v42  ;;  %v634_v48 = vrot.slane %v633_v39, 4  ;;  %v812_v50 = vsel %vm2921_vm2, %v810_v41, %v811_v35  ;;  %v410_v20 = vshll.u32 %v3160_v37, 16 }
  0x4c   : > { %v629_v52 = vsel %vm2991_vm5, %v624_v43, %v628_v1  ;;  %v2374_v54 = vcombine.low %v809_v40, %v812_v50  ;;  %v403_v56 = vrot.slane %v401_v45, 4  ;;  %v406_v58 = vrot.slane %v404_v46, 5  ;;  %v3208_v46 = vld [vmem:[%s2919_s19 + $0xb4] sm:$0xf] }
  0x4d   : > { %949 = vrot.lane.b32.xlu0 %v2358_v47, %s2874_s21  ;;  %v639_v60 = vsel %vm2991_vm5, %v634_v48, %v638_v33  ;;  %v412_v61 = vrot.slane %v410_v20, 5  ;;  %v414_v63 = vshrl.u32 %v3160_v37, 16  ;;  %v420_v5 = vshll.u32 %v3169_v36, 16 }
  0x4e   : > { %v2359_v6 = vcombine.low %v629_v52, %v639_v60  ;;  %v407_v11 = vor.u32 %v406_v58, %v403_v56  ;;  %v2327_v12 = vrot.slane %v3131_v51, 9  ;;  %v815_v13 = vrot.slane %v3137_v57, 5  ;;  %v3216_v52 = vld [vmem:[%s2919_s19 + $0xb8] sm:$0xf] }
  0x4f   : > { %v416_v15 = vrot.slane %v414_v63, 4  ;;  %v422_v16 = vrot.slane %v420_v5, 5  ;;  %v818_v10 = vrot.slane %v3145_v7, 5  ;;  %v425_v21 = vshrl.u32 %v3179_v59, 16 }
  0x50   : > { %951 = vrot.lane.b32.xlu1 %v2359_v6, %s2874_s21  ;;  %v408_v23 = vrot.slane %v407_v11, 4  ;;  %v816_v24 = vsel %vm2921_vm2, %v2327_v12, %v815_v13  ;;  %v817_v1 = vrot.slane %v815_v13, 4  ;;  %v428_v25 = vshll.u32 %v3179_v59, 16  ;;  %v270_v12 = vld [vmem:[%s2919_s19 + $0xbc] sm:$0x1] }
  0x51   : > { %1029 = vrot.lane.b32.xlu0 %v2374_v54, %s2873_s20  ;;  %v417_v26 = vor.u32 %v416_v15, %v412_v61  ;;  %v427_v27 = vrot.slane %v425_v21, 4  ;;  %v434_v29 = vshll.u32 %v3189_v14, 16  ;;  %v438_v7 = vshrl.u32 %v3189_v14, 16 }
  0x52   : > { %v413_v30 = vsel %vm2991_vm5, %v408_v23, %v412_v61  ;;  %v819_v3 = vsel %vm2921_vm2, %v817_v1, %v818_v10  ;;  %v430_v4 = vrot.slane %v428_v25, 5  ;;  %v444_v33 = vshll.u32 %v243_v18, 16 }
  0x53   : > { %v418_v35 = vrot.slane %v417_v26, 4  ;;  %v2375_v38 = vcombine.low %v816_v24, %v819_v3  ;;  %v436_v39 = vrot.slane %v434_v29, 5  ;;  %v440_v40 = vrot.slane %v438_v7, 4  ;;  %v3235_v26 = vld [vmem:[%s2919_s19 + $0xc0] sm:$0xf] }
  0x54   : > { %v431_v41 = vor.u32 %v430_v4, %v427_v27  ;;  %v446_v42 = vrot.slane %v444_v33, 5  ;;  %v2318_v43 = vrot.slane %v3157_v31, 9  ;;  %v752_v45 = vrot.slane %v3160_v37, 5  ;;  %v3243_v3 = vld [vmem:[%s2919_s19 + $0xc4] sm:$0xf] }
  0x55   : > { %v423_v47 = vsel %vm2991_vm5, %v418_v35, %v422_v16  ;;  %1031 = vrot.lane.b32.xlu0 %v2375_v38, %s2873_s20  ;;  %v441_v48 = vor.u32 %v440_v40, %v436_v39  ;;  %v755_v50 = vrot.slane %v3169_v36, 5  ;;  %v2319_v20 = vrot.slane %v3179_v59, 9 }
  0x56   : > { %v2350_v54 = vcombine.low %v413_v30, %v423_v47  ;;  %v432_v56 = vrot.slane %v431_v41, 4  ;;  %v753_v58 = vsel %vm2921_vm2, %v2318_v43, %v752_v45  ;;  %v754_v60 = vrot.slane %v752_v45, 4  ;;  %v3248_v41 = vld [vmem:[%s2919_s19 + $0xc8] sm:$0x1] }
  0x57   : > { %v442_v61 = vrot.slane %v441_v48, 4  ;;  %v759_v63 = vrot.slane %v3189_v14, 5  ;;  %v762_v5 = vrot.slane %v243_v18, 5  ;;  %v641_v6 = vshrl.u32 %v3208_v46, 16 }
  0x58   : > { %933 = vrot.lane.b32.xlu1 %v2350_v54, %s2874_s21  ;;  %v437_v36 = vsel %vm2991_vm5, %v432_v56, %v436_v39  ;;  %v756_v11 = vsel %vm2921_vm2, %v754_v60, %v755_v50  ;;  %v644_v13 = vshll.u32 %v3208_v46, 16  ;;  %v650_v15 = vshll.u32 %v3216_v52, 16 }
  0x59   : > { %v447_v16 = vsel %vm2991_vm5, %v442_v61, %v446_v42  ;;  %v2366_v10 = vcombine.low %v753_v58, %v756_v11  ;;  %v760_v18 = vsel %vm2921_vm2, %v2319_v20, %v759_v63  ;;  %v761_v21 = vrot.slane %v759_v63, 4  ;;  %v3256_v20 = vld [vmem:[%s2919_s19 + $0x54] sm:$0xf]  ;;  %v3260_v61 = vld [vmem:[%s2919_s19 + $0x58] sm:$0xf] }
  0x5a   : > { %v2351_v23 = vcombine.low %v437_v36, %v447_v16  ;;  %v643_v24 = vrot.slane %v641_v6, 4  ;;  %v646_v1 = vrot.slane %v644_v13, 5  ;;  %v652_v25 = vrot.slane %v650_v15, 5 }
  0x5b   : > { %1013 = vrot.lane.b32.xlu0 %v2366_v10, %s2873_s20  ;;  %v763_v27 = vsel %vm2921_vm2, %v761_v21, %v762_v5  ;;  %v654_v29 = vshrl.u32 %v3216_v52, 16  ;;  %v660_v7 = vshll.u32 %v270_v12, 16  ;;  %v2328_v30 = vrot.slane %v3208_v46, 9  ;;  %v3269_v10 = vld [vmem:[%s2919_s19 + $0x5c] sm:$0x1] }
  0x5c   : > { %935 = vrot.lane.b32.xlu1 %v2351_v23, %s2874_s21  ;;  %v2367_v4 = vcombine.low %v760_v18, %v763_v27  ;;  %v647_v33 = vor.u32 %v646_v1, %v643_v24  ;;  %v822_v35 = vrot.slane %v3216_v52, 5  ;;  %v825_v38 = vrot.slane %v270_v12, 5 }
  0x5d   : > { %v656_v39 = vrot.slane %v654_v29, 4  ;;  %v662_v40 = vrot.slane %v660_v7, 5  ;;  %v1120_v42 = vshrl.u32 %v3235_v26, 16  ;;  %v1123_v43 = vshll.u32 %v3235_v26, 16 }
  0x5e   : > { %v648_v45 = vrot.slane %v647_v33, 4  ;;  %v823_v47 = vsel %vm2921_vm2, %v2328_v30, %v822_v35  ;;  %v824_v48 = vrot.slane %v822_v35, 4  ;;  %v1129_v50 = vshll.u32 %v3243_v3, 16  ;;  %v3279_v33 = vld [vmem:[%s2919_s19 + $0x60] sm:$0xf] }
  0x5f   : > { %v657_v54 = vor.u32 %v656_v39, %v652_v25  ;;  %v1122_v56 = vrot.slane %v1120_v42, 4  ;;  %v1125_v58 = vrot.slane %v1123_v43, 5  ;;  %v1133_v60 = vshrl.u32 %v3243_v3, 16 }
  0x60   : > { %1015 = vrot.lane.b32.xlu1 %v2367_v4, %s2873_s20  ;;  %v653_v63 = vsel %vm2991_vm5, %v648_v45, %v652_v25  ;;  %v826_v5 = vsel %vm2921_vm2, %v824_v48, %v825_v38  ;;  %v1131_v6 = vrot.slane %v1129_v50, 5  ;;  %v1139_v36 = vshll.u32 %v3248_v41, 16  ;;  %v3289_v48 = vld [vmem:[%s2919_s19 + $0x64] sm:$0xf] }
  0x61   : > { %v658_v11 = vrot.slane %v657_v54, 4  ;;  %v2376_v12 = vcombine.low %v823_v47, %v826_v5  ;;  %v1126_v13 = vor.u32 %v1125_v58, %v1122_v56  ;;  %v1135_v15 = vrot.slane %v1133_v60, 4  ;;  %v249_v58 = vld [vmem:[%s2919_s19 + $0x68] sm:$0x1] }
  0x62   : > { %v1141_v16 = vrot.slane %v1139_v36, 5  ;;  %v449_v18 = vshrl.u32 %v3256_v20, 16  ;;  %v452_v21 = vshll.u32 %v3256_v20, 16  ;;  %v458_v23 = vshll.u32 %v3260_v61, 16 }
  0x63   : > { %v663_v24 = vsel %vm2991_vm5, %v658_v11, %v662_v40  ;;  %v1127_v1 = vrot.slane %v1126_v13, 4  ;;  %v1136_v25 = vor.u32 %v1135_v15, %v1131_v6  ;;  %v462_v27 = vshrl.u32 %v3260_v61, 16 }
  0x64   : > { %v2360_v29 = vcombine.low %v653_v63, %v663_v24  ;;  %1033 = vrot.lane.b32.xlu1 %v2376_v12, %s2873_s20  ;;  %v451_v7 = vrot.slane %v449_v18, 4  ;;  %v454_v30 = vrot.slane %v452_v21, 5  ;;  %v460_v4 = vrot.slane %v458_v23, 5 }
  0x65   : > { %v1132_v35 = vsel %vm2991_vm5, %v1127_v1, %v1131_v6  ;;  %v1137_v38 = vrot.slane %v1136_v25, 4  ;;  %v464_v39 = vrot.slane %v462_v27, 4  ;;  %v468_v40 = vshll.u32 %v3269_v10, 16  ;;  %v3308_v27 = vld [vmem:[%s2919_s19] sm:$0xf] }
  0x66   : > { %953 = vrot.lane.b32.xlu0 %v2360_v29, %s2874_s21  ;;  %v455_v42 = vor.u32 %v454_v30, %v451_v7  ;;  %v2377_v43 = vrot.slane %v3235_v26, 9  ;;  %v1148_v45 = vrot.slane %v3243_v3, 5  ;;  %v1151_v47 = vrot.slane %v3248_v41, 5 }
  0x67   : > { %v1142_v50 = vsel %vm2991_vm5, %v1137_v38, %v1141_v16  ;;  %v465_v54 = vor.u32 %v464_v39, %v460_v4  ;;  %v470_v56 = vrot.slane %v468_v40, 5  ;;  %v473_v60 = vshrl.u32 %v3279_v33, 16 }
  0x68   : > { %v2379_v63 = vcombine.low %v1132_v35, %v1142_v50  ;;  %v456_v5 = vrot.slane %v455_v42, 4  ;;  %v1149_v6 = vsel %vm2921_vm2, %v2377_v43, %v1148_v45  ;;  %v1150_v36 = vrot.slane %v1148_v45, 4 }
  0x69   : > { %v466_v11 = vrot.slane %v465_v54, 4  ;;  %v475_v12 = vrot.slane %v473_v60, 4  ;;  %v476_v41 = vshll.u32 %v3279_v33, 16  ;;  %v482_v13 = vshll.u32 %v3289_v48, 16 }
  0x6a   : > { %1159 = vrot.lane.b32.xlu0 %v2379_v63, %s2874_s21  ;;  %v461_v15 = vsel %vm2991_vm5, %v456_v5, %v460_v4  ;;  %v1152_v16 = vsel %vm2921_vm2, %v1150_v36, %v1151_v47  ;;  %v486_v18 = vshrl.u32 %v3289_v48, 16  ;;  %v492_v21 = vshll.u32 %v249_v58, 16  ;;  %v3318_v47 = vld [vmem:[%s2919_s19 + $0x4] sm:$0xf] }
  0x6b   : > { %v471_v23 = vsel %vm2991_vm5, %v466_v11, %v470_v56  ;;  %v2380_v24 = vcombine.low %v1149_v6, %v1152_v16  ;;  %v478_v1 = vrot.slane %v476_v41, 5  ;;  %v484_v25 = vrot.slane %v482_v13, 5 }
  0x6c   : > { %v2352_v29 = vcombine.low %v461_v15, %v471_v23  ;;  %v488_v7 = vrot.slane %v486_v18, 4  ;;  %v494_v30 = vrot.slane %v492_v21, 5  ;;  %v2320_v4 = vrot.slane %v3256_v20, 9 }
  0x6d   : > { %v479_v35 = vor.u32 %v478_v1, %v475_v12  ;;  %v766_v38 = vrot.slane %v3260_v61, 5  ;;  %v769_v39 = vrot.slane %v3269_v10, 5  ;;  %v2321_v40 = vrot.slane %v3279_v33, 9  ;;  %v225_v12 = vld [vmem:[%s2919_s19 + $0x8] sm:$0x1] }
  0x6e   : > { %937 = vrot.lane.b32.xlu1 %v2352_v29, %s2874_s21  ;;  %1164 = vrot.lane.b32.xlu0 %v2380_v24, %s2873_s20  ;;  %v489_v42 = vor.u32 %v488_v7, %v484_v25  ;;  %v773_v43 = vrot.slane %v3289_v48, 5  ;;  %v776_v45 = vrot.slane %v249_v58, 5  ;;  %v281_v50 = vshrl.u32 %v3308_v27, 16 }
  0x6f   : > { %v480_v54 = vrot.slane %v479_v35, 4  ;;  %v767_v56 = vsel %vm2921_vm2, %v2320_v4, %v766_v38  ;;  %v768_v10 = vrot.slane %v766_v38, 4  ;;  %v284_v60 = vshll.u32 %v3308_v27, 16  ;;  %v3344_v35 = vld [vmem:[%s2919_s19 + $0xd0] sm:$0xf] }
  0x70   : > { %v490_v63 = vrot.slane %v489_v42, 4  ;;  %v774_v5 = vsel %vm2921_vm2, %v2321_v40, %v773_v43  ;;  %v775_v6 = vrot.slane %v773_v43, 4  ;;  %v283_v36 = vrot.slane %v281_v50, 4  ;;  %v276_v42 = vld [vmem:[%s2919_s19 + $0xd4] sm:$0x1] }
  0x71   : > { %v485_v58 = vsel %vm2991_vm5, %v480_v54, %v484_v25  ;;  %v770_v11 = vsel %vm2921_vm2, %v768_v10, %v769_v39  ;;  %v286_v41 = vrot.slane %v284_v60, 5  ;;  %v290_v13 = vshll.u32 %v3318_v47, 16  ;;  %v3338_v25 = vld [vmem:[%s2919_s19 + $0xcc] sm:$0xf] }
  0x72   : > { %v495_v15 = vsel %vm2991_vm5, %v490_v63, %v494_v30  ;;  %v2368_v16 = vcombine.low %v767_v56, %v770_v11  ;;  %v777_v18 = vsel %vm2921_vm2, %v775_v6, %v776_v45  ;;  %v294_v21 = vshrl.u32 %v3318_v47, 16 }
  0x73   : > { %v2353_v23 = vcombine.low %v485_v58, %v495_v15  ;;  %v287_v24 = vor.u32 %v286_v41, %v283_v36  ;;  %v292_v1 = vrot.slane %v290_v13, 5  ;;  %v300_v7 = vshll.u32 %v225_v12, 16 }
  0x74   : > { %1017 = vrot.lane.b32.xlu0 %v2368_v16, %s2873_s20  ;;  %v296_v29 = vrot.slane %v294_v21, 4  ;;  %v2313_v4 = vrot.slane %v3308_v27, 9  ;;  %v717_v30 = vrot.slane %v3318_v47, 5  ;;  %v2369_v38 = vcombine.low %v774_v5, %v777_v18  ;;  %v2696_v5 = vld [vmem:[%s3895_s1 + $0x8] sm:$0x3f]  }
  0x75   : > { %939 = vrot.lane.b32.xlu1 %v2353_v23, %s2874_s21  ;;  %v288_v39 = vrot.slane %v287_v24, 4  ;;  %v720_v40 = vrot.slane %v225_v12, 5  ;;  %v302_v45 = vrot.slane %v300_v7, 5  ;;  %v1549_v10 = vshrl.u32 %v3338_v25, 16  ;;  %2663 = vmatprep.subr.msk.bf16.mxu0 %vm1212_vm6, %v2696_v5 }
  0x76   : > { %v297_v43 = vor.u32 %v296_v29, %v292_v1  ;;  %v718_v50 = vsel %vm2921_vm2, %v2313_v4, %v717_v30  ;;  %v719_v54 = vrot.slane %v717_v30, 4  ;;  %v1552_v60 = vshll.u32 %v3338_v25, 16  ;;  %2664 = vmatprep.subr.msk.bf16.mxu1 %vm1212_vm6, %v2696_v5 }
  0x77   : > { %v293_v56 = vsel %vm2991_vm5, %v288_v39, %v292_v1  ;;  %v1558_v63 = vshll.u32 %v3344_v35, 16  ;;  %v1562_v58 = vshrl.u32 %v3344_v35, 16  ;;  %v1568_v11 = vshll.u32 %v276_v42, 16  ;;  %v2705_v1 = vld [vmem:[%s3895_s1] sm:$0x3f]  }
  0x78   : > { %v298_v6 = vrot.slane %v297_v43, 4  ;;  %v721_v36 = vsel %vm2921_vm2, %v719_v54, %v720_v40  ;;  %v1551_v41 = vrot.slane %v1549_v10, 4  ;;  %v1554_v13 = vrot.slane %v1552_v60, 5 }
  0x79   : > { %1019 = vrot.lane.b32.xlu1 %v2369_v38, %s2873_s20  ;;  %v2361_v12 = vcombine.low %v718_v50, %v721_v36  ;;  %v1560_v15 = vrot.slane %v1558_v63, 5  ;;  %v1564_v18 = vrot.slane %v1562_v58, 4  ;;  %v1570_v24 = vrot.slane %v1568_v11, 5  ;;  %v2707_v38 = vld [vmem:[%s3895_s1 + $0x10] sm:$0x3f]  }
  0x7a   : > { %v303_v16 = vsel %vm2991_vm5, %v298_v6, %v302_v45  ;;  %v1555_v23 = vor.u32 %v1554_v13, %v1551_v41  ;;  %v2417_v7 = vrot.slane %v3338_v25, 9  ;;  %v1577_v4 = vrot.slane %v3344_v35, 5 }
  0x7b   : > { %v2345_v21 = vcombine.low %v293_v56, %v303_v16  ;;  %v1565_v29 = vor.u32 %v1564_v18, %v1560_v15  ;;  %v1580_v30 = vrot.slane %v276_v42, 5  ;;  %v1214_v40 = vsel %vm1212_vm6, %v2696_v5, 0  ;;  %v2843_v18 = vld [vmem:[%s2919_s19 + $0xc] sm:$0xf] }
  0x7c   : > { %v1556_v39 = vrot.slane %v1555_v23, 4  ;;  %v1578_v45 = vsel %vm2921_vm2, %v2417_v7, %v1577_v4  ;;  %v1579_v50 = vrot.slane %v1577_v4, 4  ;;  %2560 = vmatpush3.bf16.msra.mxu0 %v1214_v40  ;;  %2662 = vmatpush3.bf16.msra.mxu1 %v1214_v40  ;;  %v2343_v10 = vcombine.low %v3131_v51, %v3137_v57  ;;  %v2846_v40 = vld [vmem:[%s2919_s19 + $0x7c] sm:$0xf] }
  0x7d   : > { %923 = vrot.lane.b32.xlu0 %v2345_v21, %s2874_s21  ;;  %1003 = vrot.lane.b32.xlu1 %v2361_v12, %s2873_s20  ;;  %v1566_v43 = vrot.slane %v1565_v29, 4  ;;  %v2334_v5 = vcombine.low %v3157_v31, %v3160_v37  ;;  %v2335_v6 = vcombine.low %v3179_v59, %v3189_v14  ;;  %v2344_v62 = vcombine.low %v3208_v46, %v3216_v52  ;;  %v2844_v21 = vld [vmem:[%s2919_s19 + $0x10] sm:$0xf] }
  0x7e   : > { %v1561_v42 = vsel %vm2991_vm5, %v1556_v39, %v1560_v15  ;;  %2665 = vmatprep.subr.msk.bf16.mxu1 %vm1212_vm6, %v2705_v1  ;;  %v1581_v56 = vsel %vm2921_vm2, %v1579_v50, %v1580_v30  ;;  %2666 = vmatprep.subr.msk.bf16.mxu0 %vm1212_vm6, %v2707_v38  ;;  %v2378_v0 = vcombine.low %v3235_v26, %v3243_v3  ;;  %v2845_v39 = vld [vmem:[%s2919_s19 + $0x78] sm:$0xf]  ;;  %v2848_v50 = vld [vmem:[%s2919_s19 + $0x1c] sm:$0xf] }
  0x7f   : > { %v1571_v54 = vsel %vm2991_vm5, %v1566_v43, %v1570_v24  ;;  %v2420_v63 = vcombine.low %v1578_v45, %v1581_v56  ;;  %v2336_v36 = vcombine.low %v3256_v20, %v3260_v61  ;;  %v2337_v58 = vcombine.low %v3279_v33, %v3289_v48  ;;  %v2847_v45 = vld [vmem:[%s2919_s19 + $0x18] sm:$0xf] }
  0x80   : > { %v2419_v60 = vcombine.low %v1561_v42, %v1571_v54  ;;  %v2329_v11 = vcombine.low %v3308_v27, %v3318_v47  ;;  %v2330_v23 = vcombine.low %v2843_v18, %v2844_v21  ;;  %v2339_v43 = vcombine.low %v2845_v39, %v2846_v40 }
  0x81   : > { %1593 = vrot.lane.b32.xlu1 %v2420_v63, %s2873_s20  ;;  %v2331_v42 = vcombine.low %v2847_v45, %v2848_v50  ;;  %v1611_v63 = vsel %vm1212_vm6, %v2707_v38, 0  ;;  %v2418_v38 = vcombine.low %v3338_v25, %v3344_v35 }
  0x82   : > { %1588 = vrot.lane.b32.xlu0 %v2419_v60, %s2874_s21 }
  0x8a   : > { %v1024_v12 = vpop.permute.xlu0 %1023 }
  0x8c   : > { %v1022_v41 = vpop.permute.xlu1 %1021 }
  0x8f   : > { %v1006_v13 = vpop.permute.xlu0 %1005 }
  0x90   : > { %v1008_v15 = vpop.permute.xlu1 %1007 }
  0x96   : > { %v942_v16 = vpop.permute.xlu0 %941 }
  0x97   : > { %v1065_v24 = vsel %vm1035_vm7, %v2338_v22, %v942_v16  ;;  %v1385_v22 = vsel %vm1212_vm6, %v2705_v1, 0  ;;  %v2340_v1 = vcombine.low %v3013_v34, %v3016_v17  ;;  %v2341_v34 = vcombine.low %v3031_v19, %v3036_v55 }
  0x98   : > { %v3412_v29 = vsel %vm1084_vm8, %v1065_v24, %v1022_v41 }
  0x99   : > { %v926_v7 = vpop.permute.xlu1 %925  ;;  %2577 = vmatprep.mubr.msk.bf16.mxu1 %vm1179_vm9, %v3412_v29 }
  0x9a   : > { %v1041_v4 = vsel %vm1035_vm7, %v2330_v23, %v926_v7  ;;  %v2332_v7 = vcombine.low %v3055_v28, %v3062_v2  ;;  %v2342_v28 = vcombine.low %v3109_v32, %v3120_v44 }
  0x9b   : > { %v3418_v30 = vsel %vm1084_vm8, %v1041_v4, %v1006_v13  ;;  %v2333_v4 = vcombine.low %v3082_v49, %v3087_v53 }
  0x9c   : > { %2561 = vmatprep.mubr.msk.bf16.mxu0 %vm1179_vm9, %v3418_v30 }
  0x9e   : > { %v944_v8 = vpop.permute.xlu0 %943 }
  0x9f   : > { %v1068_v9 = vsel %vm1035_vm7, %v2339_v43, %v944_v8 }
  0xa0   : > { %v3429_v54 = vsel %vm1084_vm8, %v1068_v9, %v1024_v12 }
  0xa1   : > { %2578 = vmatmul.mubr.msk.bf16.vlgmr.msra.gmra.mxu1 %vm1179_vm9, %v3429_v54 }
  0xa2   : > { %2594 = vmatpush3.bf16.msra.mxu1 %v1385_v22 }
  0xa3   : > { %v928_v56 = vpop.permute.xlu1 %927 }
  0xa4   : > { %v1044_v60 = vsel %vm1035_vm7, %v2331_v42, %v928_v56 }
  0xa5   : > { %v3436_v41 = vsel %vm1084_vm8, %v1044_v60, %v1008_v15  ;;  %v946_v13 = vpop.permute.xlu0 %945 }
  0xa6   : > { %2562 = vmatmul.mubr.msk.bf16.vlgmr.msra.gmra.mxu0 %vm1179_vm9, %v3436_v41  ;;  %v1071_v12 = vsel %vm1035_vm7, %v2340_v1, %v946_v13 }
  0xa7   : > { %2628 = vmatpush3.bf16.msra.mxu0 %v1611_v63 }
  0xa9   : > { %v1026_v16 = vpop.permute.xlu0 %1025 }
  0xaa   : > { %v3444_v18 = vsel %vm1084_vm8, %v1071_v12, %v1026_v16  ;;  %v948_v21 = vpop.permute.xlu1 %947 }
  0xab   : > { %2581 = vmatprep.mubr.msk.bf16.mxu1 %vm1179_vm9, %v3444_v18  ;;  %v1074_v17 = vsel %vm1035_vm7, %v2341_v34, %v948_v21 }
  0xb0   : > { %v1028_v15 = vpop.permute.xlu0 %1027 }
  0xb1   : > { %v930_v23 = vpop.permute.xlu1 %929  ;;  %v3454_v24 = vsel %vm1084_vm8, %v1074_v17, %v1028_v15 }
  0xb2   : > { %2582 = vmatmul.mubr.msk.bf16.gmra.mxu1 %vm1179_vm9, %v3454_v24  ;;  %v1047_v40 = vsel %vm1035_vm7, %v2332_v7, %v930_v23 }
  0xb5   : > { %v932_v39 = vpop.permute.xlu1 %931 }
  0xb6   : > { %v1010_v19 = vpop.permute.xlu0 %1009  ;;  %v1050_v43 = vsel %vm1035_vm7, %v2333_v4, %v932_v39 }
  0xb7   : > { %v1092_v55 = vsel %vm1084_vm8, %v1047_v40, %v1010_v19 }
  0xb8   : > { %2565 = vmatprep.mubr.msk.bf16.mxu0 %vm1179_vm9, %v1092_v55 }
  0xb9   : > { %v1012_v8 = vpop.permute.xlu1 %1011 }
  0xba   : > { %v1094_v9 = vsel %vm1084_vm8, %v1050_v43, %v1012_v8 }
  0xbb   : > { %2566 = vmatmul.mubr.msk.bf16.gmra.mxu0 %vm1179_vm9, %v1094_v9 }
  0xbf   : > { %v950_v2 = vpop.permute.xlu0 %949 }
  0xc0   : > { %v1077_v49 = vsel %vm1035_vm7, %v2342_v28, %v950_v2 }
  0xc2   : > { %v952_v22 = vpop.permute.xlu1 %951 }
  0xc3   : > { %v1030_v53 = vpop.permute.xlu0 %1029  ;;  %v1080_v50 = vsel %vm1035_vm7, %v2343_v10, %v952_v22 }
  0xc4   : > { %v3472_v45 = vsel %vm1084_vm8, %v1077_v49, %v1030_v53 }
  0xc5   : > { %2585 = vmatprep.mubr.msk.bf16.mxu1 %vm1179_vm9, %v3472_v45 }
  0xc7   : > { %v1032_v42 = vpop.permute.xlu0 %1031 }
  0xc8   : > { %v3481_v56 = vsel %vm1084_vm8, %v1080_v50, %v1032_v42 }
  0xc9   : > { %2586 = vmatmul.mubr.msk.bf16.gmra.mxu1 %vm1179_vm9, %v3481_v56 }
  0xca   : > { %v934_v32 = vpop.permute.xlu1 %933 }
  0xcb   : > { %v1053_v44 = vsel %vm1035_vm7, %v2334_v5, %v934_v32 }
  0xcd   : > { %v1014_v60 = vpop.permute.xlu0 %1013 }
  0xce   : > { %v936_v63 = vpop.permute.xlu1 %935  ;;  %v1096_v1 = vsel %vm1084_vm8, %v1053_v44, %v1014_v60 }
  0xcf   : > { %2569 = vmatprep.mubr.msk.bf16.mxu0 %vm1179_vm9, %v1096_v1  ;;  %v1056_v51 = vsel %vm1035_vm7, %v2335_v6, %v936_v63 }
  0xd2   : > { %v1016_v57 = vpop.permute.xlu1 %1015 }
  0xd3   : > { %v1098_v10 = vsel %vm1084_vm8, %v1056_v51, %v1016_v57 }
  0xd4   : > { %2570 = vmatmul.mubr.msk.bf16.gmra.mxu0 %vm1179_vm9, %v1098_v10 }
  0xd6   : > { %v1034_v13 = vpop.permute.xlu1 %1033 }
  0xd8   : > { %v954_v31 = vpop.permute.xlu0 %953 }
  0xd9   : > { %v1083_v37 = vsel %vm1035_vm7, %v2344_v62, %v954_v31 }
  0xda   : > { %v1116_v5 = vsel %vm1084_vm8, %v1083_v37, %v1034_v13 }
  0xdb   : > { %2589 = vmatprep.mubr.msk.bf16.mxu1 %vm1179_vm9, %v1116_v5 }
  0xdc   : > { %v1160_v12 = vpop.permute.xlu0 %1159 }
  0xdd   : > { %v1168_v59 = vsel %vm1035_vm7, %v2378_v0, %v1160_v12 }
  0xe0   : > { %v1165_v14 = vpop.permute.xlu0 %1164  ;;  %v938_v6 = vpop.permute.xlu1 %937 }
  0xe1   : > { %v1170_v16 = vsel %vm1084_vm8, %v1168_v59, %v1165_v14  ;;  %v1059_v46 = vsel %vm1035_vm7, %v2336_v36, %v938_v6 }
  0xe2   : > { %2590 = vmatmul.mubr.msk.bf16.gmra.mxu1 %vm1179_vm9, %v1170_v16 }
  0xe6   : > { %v1018_v52 = vpop.permute.xlu0 %1017 }
  0xe7   : > { %v940_v62 = vpop.permute.xlu1 %939  ;;  %v1100_v21 = vsel %vm1084_vm8, %v1059_v46, %v1018_v52 }
  0xe8   : > { %2573 = vmatprep.mubr.msk.bf16.mxu0 %vm1179_vm9, %v1100_v21  ;;  %v1062_v26 = vsel %vm1035_vm7, %v2337_v58, %v940_v62 }
  0xeb   : > { %v1020_v3 = vpop.permute.xlu1 %1019 }
  0xec   : > { %v1102_v0 = vsel %vm1084_vm8, %v1062_v26, %v1020_v3 }
  0xed   : > { %2574 = vmatmul.mubr.msk.bf16.gmra.mxu0 %vm1179_vm9, %v1102_v0 }
  0xee   : > { %2629 = vmatprep.mubr.msk.bf16.mxu0 %vm1179_vm9, %v3436_v41 }
  0xef   : > { %v924_v20 = vpop.permute.xlu0 %923  ;;  %v1004_v61 = vpop.permute.xlu1 %1003 }
  0xf0   : > { %v1038_v36 = vsel %vm1035_vm7, %v2329_v11, %v924_v20 }
  0xf1   : > { %v1086_v34 = vsel %vm1084_vm8, %v1038_v36, %v1004_v61 }
  0xf2   : > { %2595 = vmatprep.mubr.msk.bf16.mxu1 %vm1179_vm9, %v1086_v34 }
  0xf3   : > { %2596 = vmatmul.mubr.msk.bf16.vlgmr.msra.gmra.mxu1 %vm1179_vm9, %v3418_v30  ;;  %v1594_v27 = vpop.permute.xlu1 %1593 }
  0xf4   : > { %2599 = vmatprep.mubr.msk.bf16.mxu1 %vm1179_vm9, %v3436_v41  ;;  %v1589_v33 = vpop.permute.xlu0 %1588 }
  0xf5   : > { %2630 = vmatmul.mubr.msk.bf16.vlgmr.msra.gmra.mxu0 %vm1179_vm9, %v1092_v55  ;;  %v1597_v48 = vsel %vm1035_vm7, %v2418_v38, %v1589_v33 }
  0xf6   : > { %2633 = vmatprep.mubr.msk.bf16.mxu0 %vm1179_vm9, %v1094_v9  ;;  %v1599_v47 = vsel %vm1084_vm8, %v1597_v48, %v1594_v27 }
  0xfb   : > { %2600 = vmatmul.mubr.msk.bf16.gmra.mxu1 %vm1179_vm9, %v1092_v55 }
  0xfc   : > { %2603 = vmatprep.mubr.msk.bf16.mxu1 %vm1179_vm9, %v1094_v9 }
  0xfd   : > { %2634 = vmatmul.mubr.msk.bf16.gmra.mxu0 %vm1179_vm9, %v1096_v1 }
  0xfe   : > { %2637 = vmatprep.mubr.msk.bf16.mxu0 %vm1179_vm9, %v1098_v10 }
 0x103   : > { %2604 = vmatmul.mubr.msk.bf16.gmra.mxu1 %vm1179_vm9, %v1096_v1  ;;  %v3629_v1 = vld [vmem:[%s3896_s2] ss:$0 sm:$0xff] }
 0x104   : > { %2607 = vmatprep.mubr.msk.bf16.mxu1 %vm1179_vm9, %v1098_v10 }
 0x105   : > { %2638 = vmatmul.mubr.msk.bf16.gmra.mxu0 %vm1179_vm9, %v1100_v21 }
 0x106   : > { %2641 = vmatprep.mubr.msk.bf16.mxu0 %vm1179_vm9, %v1102_v0 }
 0x10b   : > { %2608 = vmatmul.mubr.msk.bf16.gmra.mxu1 %vm1179_vm9, %v1100_v21 }
 0x10c   : > { %2611 = vmatprep.mubr.msk.bf16.mxu1 %vm1179_vm9, %v1102_v0 }
 0x10d   : > { %2642 = vmatmul.mubr.msk.bf16.gmra.mxu0 %vm1179_vm9, %v3412_v29 }
 0x10e   : > { %2645 = vmatprep.mubr.msk.bf16.mxu0 %vm1179_vm9, %v3429_v54 }
 0x113   : > { %2612 = vmatmul.mubr.msk.bf16.gmra.mxu1 %vm1179_vm9, %v3412_v29 }
 0x114   : > { %2615 = vmatprep.mubr.msk.bf16.mxu1 %vm1179_vm9, %v3429_v54 }
 0x115   : > { %2646 = vmatmul.mubr.msk.bf16.gmra.mxu0 %vm1179_vm9, %v3444_v18 }
 0x116   : > { %2649 = vmatprep.mubr.msk.bf16.mxu0 %vm1179_vm9, %v3454_v24 }
 0x11b   : > { %2616 = vmatmul.mubr.msk.bf16.gmra.mxu1 %vm1179_vm9, %v3444_v18 }
 0x11c   : > { %2619 = vmatprep.mubr.msk.bf16.mxu1 %vm1179_vm9, %v3454_v24 }
 0x11d   : > { %2650 = vmatmul.mubr.msk.bf16.gmra.mxu0 %vm1179_vm9, %v3472_v45 }
 0x11e   : > { %2653 = vmatprep.mubr.msk.bf16.mxu0 %vm1179_vm9, %v3481_v56 }
 0x123   : > { %2620 = vmatmul.mubr.msk.bf16.gmra.mxu1 %vm1179_vm9, %v3472_v45 }
 0x124   : > { %2623 = vmatprep.mubr.msk.bf16.mxu1 %vm1179_vm9, %v3481_v56 }
 0x125   : > { %2654 = vmatmul.mubr.msk.bf16.gmra.mxu0 %vm1179_vm9, %v1116_v5 }
 0x126   : > { %2657 = vmatprep.mubr.msk.bf16.mxu0 %vm1179_vm9, %v1170_v16 }
 0x12b   : > { %2624 = vmatmul.mubr.msk.bf16.gmra.mxu1 %vm1179_vm9, %v1116_v5 }
 0x12d   : > { %2658 = vmatmul.mubr.msk.bf16.gmra.mxu0 %vm1179_vm9, %v1599_v47 }
 0x161   : > { %v3578_v58 = vpop.f32.mrf.mxu1 }
 0x163   : > { %v3580_v11 = vpop.f32.mrf.mxu1 }
 0x165   : > { %v3582_v30 = vpop.f32.mrf.mxu1 }
 0x166   : > { %v2563_v29 = vpop.f32.mrf.mxu0 }
 0x167   : > { %v3584_v41 = vpop.f32.mrf.mxu1 }
 0x168   : > { %v1250_v54 = vpop.f32.mrf.mxu0 }
 0x16a   : > { %v2564_v35 = vpop.f32.mrf.mxu0 }
 0x16c   : > { %v1253_v38 = vpop.f32.mrf.mxu0 }
 0x172   : > { %v3586_v25 = vpop.f32.mrf.mxu1 }
 0x174   : > { %v3588_v18 = vpop.f32.mrf.mxu1 }
 0x176   : > { %v3590_v17 = vpop.f32.mrf.mxu1 }
 0x178   : > { %v3592_v23 = vpop.f32.mrf.mxu1 }
 0x17b   : > { %v2567_v15 = vpop.f32.mrf.mxu0 }
 0x17d   : > { %v1266_v24 = vpop.f32.mrf.mxu0 }
 0x17f   : > { %v2568_v4 = vpop.f32.mrf.mxu0 }
 0x181   : > { %v1269_v40 = vpop.f32.mrf.mxu0 }
 0x189   : > { %v3594_v7 = vpop.f32.mrf.mxu1 }
 0x18b   : > { %v3596_v39 = vpop.f32.mrf.mxu1 }
 0x18d   : > { %v3598_v19 = vpop.f32.mrf.mxu1 }
 0x18f   : > { %v3602_v43 = vpop.f32.mrf.mxu1 }
 0x194   : > { %v3600_v55 = vpop.f32.mrf.mxu0 }
 0x196   : > { %v3604_v8 = vpop.f32.mrf.mxu0 }
 0x198   : > { %v3608_v28 = vpop.f32.mrf.mxu0 }
 0x19a   : > { %v3612_v49 = vpop.f32.mrf.mxu0 }
 0x1a2   : > { %v3606_v9 = vpop.f32.mrf.mxu1 }
 0x1a4   : > { %v3610_v2 = vpop.f32.mrf.mxu1 }
 0x1a6   : > { %v3614_v53 = vpop.f32.mrf.mxu1 }
 0x1a8   : > { %v3620_v50 = vpop.f32.mrf.mxu1 }
 0x1ad   : > { %v3616_v22 = vpop.f32.mrf.mxu0 }
 0x1af   : > { %v3618_v45 = vpop.f32.mrf.mxu0 }
 0x1b1   : > { %v3622_v42 = vpop.f32.mrf.mxu0 }
 0x1b3   : > { %v2597_v56 = vpop.f32.mrf.mxu1  ;;  %v3624_v32 = vpop.f32.mrf.mxu0 }
 0x1b4   : > { %v1430_v44 = vadd.f32 %v2597_v56, %v2563_v29 }
 0x1b5   : > { %v1421_v60 = vpop.f32.mrf.mxu1  ;;  %v2631_v63 = vpop.f32.mrf.mxu0 }
 0x1b6   : > { %v1422_v51 = vadd.f32 %v1421_v60, %v1250_v54  ;;  %v1776_v57 = vadd.f32 %v2631_v63, %v1430_v44 }
 0x1b7   : > { %v2598_v10 = vpop.f32.mrf.mxu1  ;;  %v1647_v13 = vpop.f32.mrf.mxu0 }
 0x1b8   : > { %v3632_v31 = vadd.f32 %v3629_v1, %v1776_v57  ;;  %v1433_v37 = vadd.f32 %v2598_v10, %v2564_v35  ;;  %v1774_v5 = vadd.f32 %v1647_v13, %v1422_v51 }
 0x1b9   : > { %v1424_v12 = vpop.f32.mrf.mxu1  ;;  %v2632_v59 = vpop.f32.mrf.mxu0 }
 0x1ba   : > { %v1847_v14 = vsub.f32 0.0, %v3632_v31  ;;  %v3636_v6 = vadd.f32 %v3629_v1, %v1774_v5  ;;  %v1425_v16 = vadd.f32 %v1424_v12, %v1253_v38  ;;  %v1777_v46 = vadd.f32 %v2632_v59, %v1433_v37 }
 0x1bb   : > { %v2601_v52 = vpop.f32.mrf.mxu1  ;;  %v1650_v62 = vpop.f32.mrf.mxu0 }
 0x1bc   : > { %v1881_v21 = vmul.f32 1.442695, %v1847_v14  ;;  %v1845_v26 = vsub.f32 0.0, %v3636_v6  ;;  %v3640_v3 = vadd.f32 %v3629_v1, %v1777_v46  ;;  %v1446_v0 = vadd.f32 %v2601_v52, %v2567_v15 }
 0x1bd   : > { %v1775_v20 = vadd.f32 %v1650_v62, %v1425_v16  ;;  %v1437_v61 = vpop.f32.mrf.mxu1  ;;  %v2635_v36 = vpop.f32.mrf.mxu0 }
 0x1be   : > { %2715 = vpow2.f32 %v1881_v21  ;;  %v1877_v34 = vmul.f32 1.442695, %v1845_v26  ;;  %v1848_v33 = vsub.f32 0.0, %v3640_v3  ;;  %v1438_v48 = vadd.f32 %v1437_v61, %v1266_v24 }
 0x1bf   : > { %v3644_v27 = vadd.f32 %v3629_v1, %v1775_v20  ;;  %v1780_v47 = vadd.f32 %v2635_v36, %v1446_v0  ;;  %v2602_v29 = vpop.f32.mrf.mxu1  ;;  %v1663_v54 = vpop.f32.mrf.mxu0 }
 0x1c0   : > { %2717 = vpow2.f32 %v1877_v34  ;;  %v1883_v35 = vmul.f32 1.442695, %v1848_v33  ;;  %v1449_v38 = vadd.f32 %v2602_v29, %v2568_v4  ;;  %v1778_v56 = vadd.f32 %v1663_v54, %v1438_v48 }
 0x1c1   : > { %v1846_v15 = vsub.f32 0.0, %v3644_v27  ;;  %v3648_v44 = vadd.f32 %v3629_v1, %v1780_v47  ;;  %v1440_v60 = vpop.f32.mrf.mxu1  ;;  %v2636_v63 = vpop.f32.mrf.mxu0 }
 0x1c2   : > { %2719 = vpow2.f32 %v1883_v35  ;;  %v3651_v24 = vadd.f32 %v3629_v1, %v1778_v56  ;;  %v1441_v51 = vadd.f32 %v1440_v60, %v1269_v40  ;;  %v1781_v57 = vadd.f32 %v2636_v63, %v1449_v38 }
 0x1c3   : > { %v1879_v10 = vmul.f32 1.442695, %v1846_v15  ;;  %v1851_v13 = vsub.f32 0.0, %v3648_v44  ;;  %v2605_v37 = vpop.f32.mrf.mxu1  ;;  %v1666_v5 = vpop.f32.mrf.mxu0 }
 0x1c4   : > { %v1849_v4 = vsub.f32 0.0, %v3651_v24  ;;  %v3656_v12 = vadd.f32 %v3629_v1, %v1781_v57  ;;  %v1462_v59 = vadd.f32 %v2605_v37, %v3600_v55  ;;  %v1779_v14 = vadd.f32 %v1666_v5, %v1441_v51 }
 0x1c5   : > { %2721 = vpow2.f32 %v1879_v10  ;;  %v1889_v16 = vmul.f32 1.442695, %v1851_v13  ;;  %v1453_v46 = vpop.f32.mrf.mxu1  ;;  %v2639_v52 = vpop.f32.mrf.mxu0 }
 0x1c6   : > { %v1885_v62 = vmul.f32 1.442695, %v1849_v4  ;;  %v1852_v40 = vsub.f32 0.0, %v3656_v12  ;;  %v3661_v21 = vadd.f32 %v3629_v1, %v1779_v14  ;;  %v1454_v26 = vadd.f32 %v1453_v46, %v3604_v8 }
 0x1c7   : > { %2723 = vpow2.f32 %v1889_v16  ;;  %v1784_v0 = vadd.f32 %v2639_v52, %v1462_v59  ;;  %v2606_v20 = vpop.f32.mrf.mxu1  ;;  %v1679_v61 = vpop.f32.mrf.mxu0 }
 0x1c8   : > { %2725 = vpow2.f32 %v1885_v62  ;;  %v1891_v36 = vmul.f32 1.442695, %v1852_v40  ;;  %v1850_v55 = vsub.f32 0.0, %v3661_v21  ;;  %v1465_v34 = vadd.f32 %v2606_v20, %v3608_v28 }
 0x1c9   : > { %v3667_v33 = vadd.f32 %v3629_v1, %v1784_v0  ;;  %v1782_v48 = vadd.f32 %v1679_v61, %v1454_v26  ;;  %v1456_v47 = vpop.f32.mrf.mxu1  ;;  %v2640_v29 = vpop.f32.mrf.mxu0 }
 0x1ca   : > { %2727 = vpow2.f32 %v1891_v36  ;;  %v1887_v54 = vmul.f32 1.442695, %v1850_v55  ;;  %v1457_v8 = vadd.f32 %v1456_v47, %v3612_v49  ;;  %v1785_v35 = vadd.f32 %v2640_v29, %v1465_v34 }
 0x1cb   : > { %v2716_v38 = vpop.eup %2715  ;;  %v1855_v56 = vsub.f32 0.0, %v3667_v33  ;;  %v3672_v15 = vadd.f32 %v3629_v1, %v1782_v48  ;;  %v2609_v60 = vpop.f32.mrf.mxu1 }
 0x1cc   : > { %v1682_v63 = vpop.f32.mrf.mxu0  ;;  %v1943_v28 = vadd.f32 1.0, %v2716_v38  ;;  %2729 = vpow2.f32 %v1887_v54  ;;  %v3675_v51 = vadd.f32 %v3629_v1, %v1785_v35  ;;  %v1478_v57 = vadd.f32 %v2609_v60, %v3616_v22 }
 0x1cd   : > { %v2718_v10 = vpop.eup %2717  ;;  %v1897_v13 = vmul.f32 1.442695, %v1855_v56  ;;  %v1853_v49 = vsub.f32 0.0, %v3672_v15  ;;  %v1783_v37 = vadd.f32 %v1682_v63, %v1457_v8  ;;  %v1469_v5 = vpop.f32.mrf.mxu1 }
 0x1ce   : > { %v2643_v4 = vpop.f32.mrf.mxu0  ;;  %2731 = vrcp.f32 %v1943_v28  ;;  %v1941_v59 = vadd.f32 1.0, %v2718_v10  ;;  %v1856_v14 = vsub.f32 0.0, %v3675_v51  ;;  %v1470_v16 = vadd.f32 %v1469_v5, %v3618_v45 }
 0x1cf   : > { %v2720_v46 = vpop.eup %2719  ;;  %2733 = vpow2.f32 %v1897_v13  ;;  %v1893_v52 = vmul.f32 1.442695, %v1853_v49  ;;  %v3682_v62 = vadd.f32 %v3629_v1, %v1783_v37  ;;  %v1788_v22 = vadd.f32 %v2643_v4, %v1478_v57  ;;  %v2610_v40 = vpop.f32.mrf.mxu1 }
 0x1d0   : > { %v1695_v26 = vpop.f32.mrf.mxu0  ;;  %2735 = vrcp.f32 %v1941_v59  ;;  %v1944_v0 = vadd.f32 1.0, %v2720_v46  ;;  %v1899_v20 = vmul.f32 1.442695, %v1856_v14  ;;  %v1481_v61 = vadd.f32 %v2610_v40, %v3622_v42 }
 0x1d1   : > { %2737 = vpow2.f32 %v1893_v52  ;;  %v1854_v36 = vsub.f32 0.0, %v3682_v62  ;;  %v3687_v55 = vadd.f32 %v3629_v1, %v1788_v22  ;;  %v1786_v45 = vadd.f32 %v1695_v26, %v1470_v16  ;;  %v1472_v34 = vpop.f32.mrf.mxu1 }
 0x1d2   : > { %v2644_v48 = vpop.f32.mrf.mxu0  ;;  %v2722_v47 = vpop.eup %2721  ;;  %2739 = vrcp.f32 %v1944_v0  ;;  %v1473_v29 = vadd.f32 %v1472_v34, %v3624_v32 }
 0x1d3   : > { %v1789_v54 = vadd.f32 %v2644_v48, %v1481_v61  ;;  %v1942_v8 = vadd.f32 1.0, %v2722_v47  ;;  %2741 = vpow2.f32 %v1899_v20  ;;  %v1895_v35 = vmul.f32 1.442695, %v1854_v36  ;;  %v2613_v42 = vpop.f32.mrf.mxu1 }
 0x1d4   : > { %v1859_v38 = vsub.f32 0.0, %v3687_v55  ;;  %v1698_v56 = vpop.f32.mrf.mxu0  ;;  %v2724_v60 = vpop.eup %2723  ;;  %v3692_v63 = vadd.f32 %v3629_v1, %v1786_v45  ;;  %v1494_v57 = vadd.f32 %v2613_v42, %v3578_v58 }
 0x1d5   : > { %v3695_v28 = vadd.f32 %v3629_v1, %v1789_v54  ;;  %v1787_v10 = vadd.f32 %v1698_v56, %v1473_v29  ;;  %v2726_v13 = vpop.eup %2725  ;;  %2743 = vrcp.f32 %v1942_v8  ;;  %v1947_v32 = vadd.f32 1.0, %v2724_v60  ;;  %v1485_v37 = vpop.f32.mrf.mxu1 }
 0x1d6   : > { %v1905_v49 = vmul.f32 1.442695, %v1859_v38  ;;  %v2647_v5 = vpop.f32.mrf.mxu0  ;;  %v1945_v4 = vadd.f32 1.0, %v2726_v13  ;;  %2745 = vpow2.f32 %v1895_v35  ;;  %v1857_v59 = vsub.f32 0.0, %v3692_v63 }
 0x1d7   : > { %v1860_v14 = vsub.f32 0.0, %v3695_v28  ;;  %v2728_v16 = vpop.eup %2727  ;;  %2747 = vrcp.f32 %v1947_v32  ;;  %v3701_v46 = vadd.f32 %v3629_v1, %v1787_v10  ;;  %v1486_v58 = vadd.f32 %v1485_v37, %v3580_v11  ;;  %v2614_v22 = vpop.f32.mrf.mxu1 }
 0x1d8   : > { %v1792_v52 = vadd.f32 %v2647_v5, %v1494_v57  ;;  %v1711_v40 = vpop.f32.mrf.mxu0  ;;  %2749 = vrcp.f32 %v1945_v4  ;;  %v1948_v26 = vadd.f32 1.0, %v2728_v16  ;;  %v1901_v0 = vmul.f32 1.442695, %v1857_v59 }
 0x1d9   : > { %v1907_v20 = vmul.f32 1.442695, %v1860_v14  ;;  %v2730_v61 = vpop.eup %2729  ;;  %2751 = vpow2.f32 %v1905_v49  ;;  %v1858_v36 = vsub.f32 0.0, %v3701_v46  ;;  %v1497_v34 = vadd.f32 %v2614_v22, %v3582_v30  ;;  %v1488_v48 = vpop.f32.mrf.mxu1 }
 0x1da   : > { %v3706_v45 = vadd.f32 %v3629_v1, %v1792_v52  ;;  %v2648_v47 = vpop.f32.mrf.mxu0  ;;  %2753 = vrcp.f32 %v1948_v26  ;;  %v1946_v11 = vadd.f32 1.0, %v2730_v61  ;;  %v1790_v29 = vadd.f32 %v1711_v40, %v1486_v58 }
 0x1db   : > { %v1489_v54 = vadd.f32 %v1488_v48, %v3584_v41  ;;  %v2732_v8 = vpop.eup %2731  ;;  %2755 = vpow2.f32 %v1901_v0  ;;  %v1903_v35 = vmul.f32 1.442695, %v1858_v36  ;;  %v1793_v42 = vadd.f32 %v2648_v47, %v1497_v34  ;;  %v2617_v56 = vpop.f32.mrf.mxu1 }
 0x1dc   : > { %v1863_v38 = vsub.f32 0.0, %v3706_v45  ;;  %v1714_v60 = vpop.f32.mrf.mxu0  ;;  %v2734_v57 = vpop.eup %2733  ;;  %v2007_v10 = vmul.f32 %v2732_v8, %v3632_v31  ;;  %2757 = vrcp.f32 %v1946_v11  ;;  %v3714_v30 = vadd.f32 %v3629_v1, %v1790_v29 }
 0x1dd   : > { %v1510_v13 = vadd.f32 %v2617_v56, %v3586_v25  ;;  %v2736_v32 = vpop.eup %2735  ;;  %v1951_v41 = vadd.f32 1.0, %v2734_v57  ;;  %2759 = vpow2.f32 %v1907_v20  ;;  %v3723_v37 = vadd.f32 %v3629_v1, %v1793_v42  ;;  %v1501_v31 = vpop.f32.mrf.mxu1 }
 0x1de   : > { %v1913_v49 = vmul.f32 1.442695, %v1863_v38  ;;  %v2651_v5 = vpop.f32.mrf.mxu0  ;;  %v2738_v4 = vpop.eup %2737  ;;  %v2478_v59 = vpack.c.bf16 %v2007_v10, %v2007_v10  ;;  %v2005_v14 = vmul.f32 %v2736_v32, %v3636_v6  ;;  %2761 = vpow2.f32 %v1903_v35 }
 0x1df   : > { %v1861_v25 = vsub.f32 0.0, %v3714_v30  ;;  %v2740_v16 = vpop.eup %2739  ;;  %2763 = vrcp.f32 %v1951_v41  ;;  %v1949_v58 = vadd.f32 1.0, %v2738_v4  ;;  %v1864_v52 = vsub.f32 0.0, %v3723_v37  ;;  %v2618_v40 = vpop.f32.mrf.mxu1 }
 0x1e0   : > { %v1791_v22 = vadd.f32 %v1714_v60, %v1489_v54  ;;  %v1727_v26 = vpop.f32.mrf.mxu0  ;;  %v2742_v0 = vpop.eup %2741  ;;  %2168 = vst.msk [vmem:[%s3720_s6 + $0x8] sm:$0xf] %vm2165_vm10, %v2478_v59  ;;  %v2476_v20 = vpack.c.bf16 %v2005_v14, %v2005_v14  ;;  %v2008_v61 = vmul.f32 %v2740_v16, %v3640_v3  ;;  %2765 = vpow2.f32 %v1913_v49 }
 0x1e1   : > { %v1909_v6 = vmul.f32 1.442695, %v1861_v25  ;;  %2767 = vrcp.f32 %v1949_v58  ;;  %v1952_v36 = vadd.f32 1.0, %v2742_v0  ;;  %v1915_v34 = vmul.f32 1.442695, %v1864_v52  ;;  %v1504_v47 = vpop.f32.mrf.mxu1 }
 0x1e2   : > { %v3732_v48 = vadd.f32 %v3629_v1, %v1791_v22  ;;  %v2652_v11 = vpop.f32.mrf.mxu0  ;;  %v2744_v29 = vpop.eup %2743  ;;  %2166 = vst.msk [vmem:[%s3720_s6] sm:$0xf] %vm2165_vm10, %v2476_v20  ;;  %v2479_v54 = vpack.c.bf16 %v2008_v61, %v2008_v61  ;;  %v1502_v8 = vadd.f32 %v1501_v31, %v3588_v18  ;;  %v1796_v35 = vadd.f32 %v2651_v5, %v1510_v13 }
 0x1e3   : > { %2769 = vpow2.f32 %v1909_v6  ;;  %v2746_v3 = vpop.eup %2745  ;;  %v2006_v38 = vmul.f32 %v2744_v29, %v3644_v27  ;;  %v1513_v56 = vadd.f32 %v2618_v40, %v3590_v17  ;;  %v2621_v60 = vpop.f32.mrf.mxu1  ;;  %v1505_v5 = vadd.f32 %v1504_v47, %v3592_v23 }
 0x1e4   : > { %2771 = vrcp.f32 %v1952_v36  ;;  %v1862_v42 = vsub.f32 0.0, %v3732_v48  ;;  %v1730_v57 = vpop.f32.mrf.mxu0  ;;  %v2748_v10 = vpop.eup %2747  ;;  %2169 = vst.msk [vmem:[%s3720_s6 + $0xc] sm:$0xf] %vm2165_vm10, %v2479_v54  ;;  %v1950_v32 = vadd.f32 1.0, %v2746_v3  ;;  %v3743_v41 = vadd.f32 %v3629_v1, %v1796_v35 }
 0x1e5   : > { %2773 = vpow2.f32 %v1915_v34  ;;  %v1794_v18 = vadd.f32 %v1727_v26, %v1502_v8  ;;  %v2750_v13 = vpop.eup %2749  ;;  %v2477_v49 = vpack.c.bf16 %v2006_v38, %v2006_v38  ;;  %v2011_v27 = vmul.f32 %v2748_v10, %v3648_v44  ;;  %v1517_v17 = vpop.f32.mrf.mxu1 }
 0x1e6   : > { %v1911_v31 = vmul.f32 1.442695, %v1862_v42  ;;  %v2655_v4 = vpop.f32.mrf.mxu0  ;;  %v2752_v59 = vpop.eup %2751  ;;  %v2009_v14 = vmul.f32 %v2750_v13, %v3651_v24  ;;  %2775 = vrcp.f32 %v1950_v32  ;;  %v1867_v25 = vsub.f32 0.0, %v3743_v41 }
 0x1e7   : > { %v3750_v16 = vadd.f32 %v3629_v1, %v1794_v18  ;;  %v2754_v58 = vpop.eup %2753  ;;  %2167 = vst.msk [vmem:[%s3720_s6 + $0x4] sm:$0xf] %vm2165_vm10, %v2477_v49  ;;  %v2482_v52 = vpack.c.bf16 %v2011_v27, %v2011_v27  ;;  %v1955_v44 = vadd.f32 1.0, %v2752_v59  ;;  %v1797_v22 = vadd.f32 %v2652_v11, %v1513_v56  ;;  %v2622_v23 = vpop.f32.mrf.mxu1 }
 0x1e8   : > { %2777 = vpow2.f32 %v1911_v31  ;;  %v1743_v40 = vpop.f32.mrf.mxu0  ;;  %v2756_v26 = vpop.eup %2755  ;;  %v2480_v0 = vpack.c.bf16 %v2009_v14, %v2009_v14  ;;  %v2012_v24 = vmul.f32 %v2754_v58, %v3656_v12  ;;  %v1921_v20 = vmul.f32 1.442695, %v1867_v25 }
 0x1e9   : > { %v1865_v61 = vsub.f32 0.0, %v3750_v16  ;;  %v2758_v6 = vpop.eup %2757  ;;  %2172 = vst.msk [vmem:[%s3720_s6 + $0x18] sm:$0xf] %vm2165_vm10, %v2482_v52  ;;  %2779 = vrcp.f32 %v1955_v44  ;;  %v1953_v36 = vadd.f32 1.0, %v2756_v26  ;;  %v3759_v34 = vadd.f32 %v3629_v1, %v1797_v22  ;;  %v1520_v11 = vpop.f32.mrf.mxu1 }
 0x1ea   : > { %v1526_v47 = vadd.f32 %v2621_v60, %v3594_v7  ;;  %v2656_v29 = vpop.f32.mrf.mxu0  ;;  %v2760_v54 = vpop.eup %2759  ;;  %2170 = vst.msk [vmem:[%s3720_s6 + $0x10] sm:$0xf] %vm2165_vm10, %v2480_v0  ;;  %v2483_v12 = vpack.c.bf16 %v2012_v24, %v2012_v24  ;;  %v2010_v8 = vmul.f32 %v2758_v6, %v3661_v21  ;;  %2781 = vpow2.f32 %v1921_v20 }
 0x1eb   : > { %v1917_v35 = vmul.f32 1.442695, %v1865_v61  ;;  %v2762_v3 = vpop.eup %2761  ;;  %2783 = vrcp.f32 %v1953_v36  ;;  %v1956_v38 = vadd.f32 1.0, %v2760_v54  ;;  %v1868_v42 = vsub.f32 0.0, %v3759_v34  ;;  %v2625_v31 = vpop.f32.mrf.mxu1 }
 0x1ec   : > { %v1795_v56 = vadd.f32 %v1730_v57, %v1505_v5  ;;  %v2764_v10 = vpop.eup %2763  ;;  %2173 = vst.msk [vmem:[%s3720_s6 + $0x1c] sm:$0xf] %vm2165_vm10, %v2483_v12  ;;  %v2481_v7 = vpack.c.bf16 %v2010_v8, %v2010_v8  ;;  %v1954_v60 = vadd.f32 1.0, %v2762_v3  ;;  %v1518_v32 = vadd.f32 %v1517_v17, %v3596_v39  ;;  %v1746_v18 = vpop.f32.mrf.mxu0 }
 0x1ed   : > { %2785 = vpow2.f32 %v1917_v35  ;;  %v2766_v13 = vpop.eup %2765  ;;  %v2015_v21 = vmul.f32 %v2764_v10, %v3667_v33  ;;  %v1923_v49 = vmul.f32 1.442695, %v1868_v42  ;;  %v1800_v5 = vadd.f32 %v2655_v4, %v1526_v47  ;;  %v1533_v24 = vpop.f32.mrf.mxu1 }
 0x1ee   : > { %2787 = vrcp.f32 %v1956_v38  ;;  %v3771_v27 = vadd.f32 %v3629_v1, %v1795_v56  ;;  %v2768_v59 = vpop.eup %2767  ;;  %2171 = vst.msk [vmem:[%s3720_s6 + $0x14] sm:$0xf] %vm2165_vm10, %v2481_v7  ;;  %v1959_v57 = vadd.f32 1.0, %v2766_v13  ;;  %v1529_v14 = vadd.f32 %v2622_v23, %v3598_v19  ;;  %v2659_v26 = vpop.f32.mrf.mxu0 }
 0x1ef   : > { %2789 = vrcp.f32 %v1954_v60  ;;  %v2486_v17 = vpack.c.bf16 %v2015_v21, %v2015_v21  ;;  %v2013_v25 = vmul.f32 %v2768_v59, %v3672_v15  ;;  %v3779_v44 = vadd.f32 %v3629_v1, %v1800_v5  ;;  %v2626_v42 = vpop.f32.mrf.mxu1 }
 0x1f0   : > { %v2770_v39 = vpop.eup %2769  ;;  %2791 = vpow2.f32 %v1923_v49  ;;  %v1866_v33 = vsub.f32 0.0, %v3771_v27  ;;  %v1798_v22 = vadd.f32 %v1743_v40, %v1518_v32  ;;  %v1521_v15 = vadd.f32 %v1520_v11, %v3602_v43  ;;  %v1759_v8 = vpop.f32.mrf.mxu0 }
 0x1f1   : > { %v2772_v58 = vpop.eup %2771  ;;  %2793 = vrcp.f32 %v1959_v57  ;;  %v1957_v52 = vadd.f32 1.0, %v2770_v39  ;;  %2176 = vst.msk [vmem:[%s3720_s6 + $0x28] sm:$0xf] %vm2165_vm10, %v2486_v17  ;;  %v2484_v19 = vpack.c.bf16 %v2013_v25, %v2013_v25  ;;  %v1871_v61 = vsub.f32 0.0, %v3779_v44 }
 0x1f2   : > { %v2774_v0 = vpop.eup %2773  ;;  %v2016_v4 = vmul.f32 %v2772_v58, %v3675_v51  ;;  %v1919_v23 = vmul.f32 1.442695, %v1866_v33  ;;  %v3787_v6 = vadd.f32 %v3629_v1, %v1798_v22  ;;  %v1801_v47 = vadd.f32 %v2656_v29, %v1529_v14  ;;  %v1536_v58 = vpop.f32.mrf.mxu1 }
 0x1f3   : > { %2795 = vrcp.f32 %v1957_v52  ;;  %v1960_v20 = vadd.f32 1.0, %v2774_v0  ;;  %v2776_v40 = vpop.eup %2775  ;;  %2174 = vst.msk [vmem:[%s3720_s6 + $0x20] sm:$0xf] %vm2165_vm10, %v2484_v19  ;;  %v1542_v51 = vadd.f32 %v2625_v31, %v3606_v9  ;;  %v1929_v11 = vmul.f32 1.442695, %v1871_v61  ;;  %v2660_v31 = vpop.f32.mrf.mxu0 }
 0x1f4   : > { %v2487_v36 = vpack.c.bf16 %v2016_v4, %v2016_v4  ;;  %2797 = vpow2.f32 %v1919_v23  ;;  %v2014_v43 = vmul.f32 %v2776_v40, %v3682_v62  ;;  %v1869_v12 = vsub.f32 0.0, %v3787_v6 }
 0x1f5   : > { %v2778_v54 = vpop.eup %2777  ;;  %2799 = vrcp.f32 %v1960_v20  ;;  %v3797_v3 = vadd.f32 %v3629_v1, %v1801_v47  ;;  %v1799_v38 = vadd.f32 %v1746_v18, %v1521_v15  ;;  %v1534_v29 = vadd.f32 %v1533_v24, %v3610_v2  ;;  %v1762_v23 = vpop.f32.mrf.mxu0 }
 0x1f6   : > { %2177 = vst.msk [vmem:[%s3720_s6 + $0x2c] sm:$0xf] %vm2165_vm10, %v2487_v36  ;;  %v1958_v35 = vadd.f32 1.0, %v2778_v54  ;;  %v2780_v9 = vpop.eup %2779  ;;  %v2485_v56 = vpack.c.bf16 %v2014_v43, %v2014_v43  ;;  %2801 = vpow2.f32 %v1929_v11  ;;  %v1925_v62 = vmul.f32 1.442695, %v1869_v12 }
 0x1f7   : > { %v1804_v10 = vadd.f32 %v2659_v26, %v1542_v51  ;;  %v2782_v7 = vpop.eup %2781  ;;  %v2019_v60 = vmul.f32 %v2780_v9, %v3687_v55  ;;  %v1872_v32 = vsub.f32 0.0, %v3797_v3  ;;  %v3803_v13 = vadd.f32 %v3629_v1, %v1799_v38 }
 0x1f8   : > { %2803 = vrcp.f32 %v1958_v35  ;;  %v2784_v21 = vpop.eup %2783  ;;  %2175 = vst.msk [vmem:[%s3720_s6 + $0x24] sm:$0xf] %vm2165_vm10, %v2485_v56  ;;  %v1963_v18 = vadd.f32 1.0, %v2782_v7  ;;  %v1545_v49 = vadd.f32 %v2626_v42, %v3614_v53  ;;  %v1802_v33 = vadd.f32 %v1759_v8, %v1534_v29 }
 0x1f9   : > { %2805 = vpow2.f32 %v1925_v62  ;;  %v3808_v2 = vadd.f32 %v3629_v1, %v1804_v10  ;;  %v2490_v55 = vpack.c.bf16 %v2019_v60, %v2019_v60  ;;  %v2017_v57 = vmul.f32 %v2784_v21, %v3692_v63 }
 0x1fa   : > { %v2786_v59 = vpop.eup %2785  ;;  %v1931_v5 = vmul.f32 1.442695, %v1872_v32  ;;  %v1870_v14 = vsub.f32 0.0, %v3803_v13  ;;  %2807 = vrcp.f32 %v1963_v18  ;;  %v3819_v4 = vadd.f32 %v3629_v1, %v1802_v33 }
 0x1fb   : > { %v2788_v39 = vpop.eup %2787  ;;  %v1961_v17 = vadd.f32 1.0, %v2786_v59  ;;  %v1875_v25 = vsub.f32 0.0, %v3808_v2  ;;  %2180 = vst.msk [vmem:[%s3720_s6 + $0x38] sm:$0xf] %vm2165_vm10, %v2490_v55  ;;  %v2488_v53 = vpack.c.bf16 %v2017_v57, %v2017_v57  ;;  %v1805_v47 = vadd.f32 %v2660_v31, %v1545_v49 }
 0x1fc   : > { %v2790_v52 = vpop.eup %2789  ;;  %v2020_v22 = vmul.f32 %v2788_v39, %v3695_v28  ;;  %2809 = vpow2.f32 %v1931_v5  ;;  %v1927_v26 = vmul.f32 1.442695, %v1870_v14  ;;  %v1537_v28 = vadd.f32 %v1536_v58, %v3620_v50 }
 0x1fd   : > { %v2792_v63 = vpop.eup %2791  ;;  %v2018_v0 = vmul.f32 %v2790_v52, %v3701_v46  ;;  %2811 = vrcp.f32 %v1961_v17  ;;  %v1937_v19 = vmul.f32 1.442695, %v1875_v25  ;;  %2178 = vst.msk [vmem:[%s3720_s6 + $0x30] sm:$0xf] %vm2165_vm10, %v2488_v53  ;;  %v1873_v46 = vsub.f32 0.0, %v3819_v4 }
 0x1fe   : > { %v2794_v15 = vpop.eup %2793  ;;  %v2491_v24 = vpack.c.bf16 %v2020_v22, %v2020_v22  ;;  %v1964_v20 = vadd.f32 1.0, %v2792_v63  ;;  %2813 = vpow2.f32 %v1927_v26  ;;  %v1803_v51 = vadd.f32 %v1762_v23, %v1537_v28 }
 0x1ff   : > { %v2489_v61 = vpack.c.bf16 %v2018_v0, %v2018_v0  ;;  %v2023_v40 = vmul.f32 %v2794_v15, %v3706_v45  ;;  %2815 = vpow2.f32 %v1937_v19  ;;  %v1933_v11 = vmul.f32 1.442695, %v1873_v46 }
 0x200   : > { %v2796_v36 = vpop.eup %2795  ;;  %2181 = vst.msk [vmem:[%s3720_s6 + $0x3c] sm:$0xf] %vm2165_vm10, %v2491_v24  ;;  %2817 = vrcp.f32 %v1964_v20  ;;  %v3832_v8 = vadd.f32 %v3629_v1, %v1805_v47  ;;  %v3835_v35 = vadd.f32 %v3629_v1, %v1803_v51 }
 0x201   : > { %v2798_v54 = vpop.eup %2797  ;;  %2179 = vst.msk [vmem:[%s3720_s6 + $0x34] sm:$0xf] %vm2165_vm10, %v2489_v61  ;;  %v2494_v43 = vpack.c.bf16 %v2023_v40, %v2023_v40  ;;  %v2021_v50 = vmul.f32 %v2796_v36, %v3714_v30  ;;  %2819 = vpow2.f32 %v1933_v11 }
 0x202   : > { %v2800_v12 = vpop.eup %2799  ;;  %v1962_v45 = vadd.f32 1.0, %v2798_v54  ;;  %v1876_v30 = vsub.f32 0.0, %v3832_v8  ;;  %v1874_v9 = vsub.f32 0.0, %v3835_v35 }
 0x203   : > { %2184 = vst.msk [vmem:[%s3720_s6 + $0x48] sm:$0xf] %vm2165_vm10, %v2494_v43  ;;  %v2492_v38 = vpack.c.bf16 %v2021_v50, %v2021_v50  ;;  %v2024_v29 = vmul.f32 %v2800_v12, %v3723_v37  ;;  %v2802_v42 = vpop.eup %2801 }
 0x204   : > { %2821 = vrcp.f32 %v1962_v45  ;;  %v1967_v1 = vadd.f32 1.0, %v2802_v42  ;;  %v1939_v60 = vmul.f32 1.442695, %v1876_v30  ;;  %v1935_v32 = vmul.f32 1.442695, %v1874_v9 }
 0x205   : > { %v2804_v56 = vpop.eup %2803  ;;  %2182 = vst.msk [vmem:[%s3720_s6 + $0x40] sm:$0xf] %vm2165_vm10, %v2492_v38  ;;  %v2495_v62 = vpack.c.bf16 %v2024_v29, %v2024_v29 }
 0x206   : > { %v2806_v10 = vpop.eup %2805  ;;  %v2022_v7 = vmul.f32 %v2804_v56, %v3732_v48  ;;  %2823 = vrcp.f32 %v1967_v1 }
 0x207   : > { %2185 = vst.msk [vmem:[%s3720_s6 + $0x4c] sm:$0xf] %vm2165_vm10, %v2495_v62  ;;  %v1965_v37 = vadd.f32 1.0, %v2806_v10  ;;  %v2808_v21 = vpop.eup %2807  ;;  %2825 = vpow2.f32 %v1939_v60 }
 0x208   : > { %v2493_v18 = vpack.c.bf16 %v2022_v7, %v2022_v7  ;;  %v2027_v31 = vmul.f32 %v2808_v21, %v3743_v41 }
 0x209   : > { %v2810_v49 = vpop.eup %2809  ;;  %2827 = vrcp.f32 %v1965_v37 }
 0x20a   : > { %v2812_v59 = vpop.eup %2811  ;;  %2183 = vst.msk [vmem:[%s3720_s6 + $0x44] sm:$0xf] %vm2165_vm10, %v2493_v18  ;;  %v1968_v55 = vadd.f32 1.0, %v2810_v49  ;;  %2829 = vpow2.f32 %v1935_v32  ;;  %v2498_v57 = vpack.c.bf16 %v2027_v31, %v2027_v31 }
 0x20b   : > { %v2814_v48 = vpop.eup %2813  ;;  %v2025_v5 = vmul.f32 %v2812_v59, %v3750_v16 }
 0x20c   : > { %v2816_v14 = vpop.eup %2815  ;;  %2831 = vrcp.f32 %v1968_v55  ;;  %v1966_v39 = vadd.f32 1.0, %v2814_v48  ;;  %2188 = vst.msk [vmem:[%s3720_s6 + $0x58] sm:$0xf] %vm2165_vm10, %v2498_v57 }
 0x20d   : > { %v2818_v17 = vpop.eup %2817  ;;  %v2496_v25 = vpack.c.bf16 %v2025_v5, %v2025_v5  ;;  %v1971_v41 = vadd.f32 1.0, %v2816_v14 }
 0x20e   : > { %v2028_v33 = vmul.f32 %v2818_v17, %v3759_v34  ;;  %2833 = vrcp.f32 %v1966_v39  ;;  %v2820_v58 = vpop.eup %2819 }
 0x20f   : > { %2186 = vst.msk [vmem:[%s3720_s6 + $0x50] sm:$0xf] %vm2165_vm10, %v2496_v25  ;;  %2835 = vrcp.f32 %v1971_v41  ;;  %v1969_v16 = vadd.f32 1.0, %v2820_v58 }
 0x210   : > { %v2499_v52 = vpack.c.bf16 %v2028_v33, %v2028_v33 }
 0x211   : > { %v2822_v53 = vpop.eup %2821  ;;  %2837 = vrcp.f32 %v1969_v16 }
 0x212   : > { %2189 = vst.msk [vmem:[%s3720_s6 + $0x5c] sm:$0xf] %vm2165_vm10, %v2499_v52  ;;  %v2026_v22 = vmul.f32 %v2822_v53, %v3771_v27 }
 0x213   : > { %v2824_v26 = vpop.eup %2823 }
 0x214   : > { %v2497_v63 = vpack.c.bf16 %v2026_v22, %v2026_v22  ;;  %v2826_v0 = vpop.eup %2825  ;;  %v2031_v34 = vmul.f32 %v2824_v26, %v3779_v44 }
 0x215   : > { %v1972_v23 = vadd.f32 1.0, %v2826_v0 }
 0x216   : > { %v2828_v19 = vpop.eup %2827  ;;  %2187 = vst.msk [vmem:[%s3720_s6 + $0x54] sm:$0xf] %vm2165_vm10, %v2497_v63  ;;  %v2502_v24 = vpack.c.bf16 %v2031_v34, %v2031_v34 }
 0x217   : > { %v2830_v15 = vpop.eup %2829  ;;  %v2029_v20 = vmul.f32 %v2828_v19, %v3787_v6  ;;  %2839 = vrcp.f32 %v1972_v23 }
 0x218   : > { %v1970_v28 = vadd.f32 1.0, %v2830_v15  ;;  %2192 = vst.msk [vmem:[%s3720_s6 + $0x68] sm:$0xf] %vm2165_vm10, %v2502_v24 }
 0x219   : > { %v2832_v27 = vpop.eup %2831  ;;  %v2500_v61 = vpack.c.bf16 %v2029_v20, %v2029_v20 }
 0x21a   : > { %v2032_v40 = vmul.f32 %v2832_v27, %v3797_v3  ;;  %2841 = vrcp.f32 %v1970_v28 }
 0x21b   : > { %v2834_v44 = vpop.eup %2833  ;;  %2190 = vst.msk [vmem:[%s3720_s6 + $0x60] sm:$0xf] %vm2165_vm10, %v2500_v61 }
 0x21c   : > { %v2836_v46 = vpop.eup %2835  ;;  %v2503_v36 = vpack.c.bf16 %v2032_v40, %v2032_v40  ;;  %v2030_v47 = vmul.f32 %v2834_v44, %v3803_v13 }
 0x21d   : > { %v2035_v6 = vmul.f32 %v2836_v46, %v3808_v2 }
 0x21e   : > { %2193 = vst.msk [vmem:[%s3720_s6 + $0x6c] sm:$0xf] %vm2165_vm10, %v2503_v36  ;;  %v2501_v51 = vpack.c.bf16 %v2030_v47, %v2030_v47  ;;  %v2838_v43 = vpop.eup %2837 }
 0x21f   : > { %v2506_v54 = vpack.c.bf16 %v2035_v6, %v2035_v6  ;;  %v2033_v3 = vmul.f32 %v2838_v43, %v3819_v4 }
 0x220   : > { %2191 = vst.msk [vmem:[%s3720_s6 + $0x64] sm:$0xf] %vm2165_vm10, %v2501_v51 }
 0x221   : > { %2196 = vst.msk [vmem:[%s3720_s6 + $0x78] sm:$0xf] %vm2165_vm10, %v2506_v54  ;;  %v2504_v50 = vpack.c.bf16 %v2033_v3, %v2033_v3 }
 0x223   : > { %2194 = vst.msk [vmem:[%s3720_s6 + $0x70] sm:$0xf] %vm2165_vm10, %v2504_v50 }
 0x224   : > { %v2840_v11 = vpop.eup %2839 }
 0x225   : > { %v2036_v13 = vmul.f32 %v2840_v11, %v3832_v8 }
 0x227   : > { %v2842_v12 = vpop.eup %2841  ;;  %v2507_v2 = vpack.c.bf16 %v2036_v13, %v2036_v13 }
 0x228   : > { %v2034_v45 = vmul.f32 %v2842_v12, %v3835_v35 }
 0x229   : > { %2197 = vst.msk [vmem:[%s3720_s6 + $0x7c] sm:$0xf] %vm2165_vm10, %v2507_v2 }
 0x22a   : > { %v2505_v38 = vpack.c.bf16 %v2034_v45, %v2034_v45 }
 0x22c   : > { %2195 = vst.msk [vmem:[%s3720_s6 + $0x74] sm:$0xf] %vm2165_vm10, %v2505_v38 }
 0x22d PF: > { %s13_s14 = sadd.s32 1, %s2871_s14   ;;  %s3902_s12 = smov %s2867_s13 }
 0x22e   : > { %p10_p5 = scmp.ge.s32.totalorder %s13_s14, 4   ;;  %s3903_s13 = smov %s3905_s15 }
 0x230   :  { %12 = sbr.rel (!%p10_p5) target bundleno = 2 (0x2), region = 70 }

</bundles_post_ra>
